<compile_context>
chip_gen: v6e
topology: v6e:2x2x1
jax: 0.10.0
libtpu: 0.0.40
codegen_flags: <defaults>
</compile_context>

<pallas_src>
import numpy as np
import jax
import jax.numpy as jnp
from jax import lax
from jax.experimental import pallas as pl
from jax.experimental.pallas import tpu as pltpu

BN_EPS = 1e-5


# -----------------------------------------------------------------------------
# Wrapper-side static helpers (tiny constant matrices, built once, host side).
# -----------------------------------------------------------------------------
def _fold_weight(w):
    """(Cout, Cin, K) -> (Cout, K*Cin); column k*Cin + c <-> tap k, channel c.
    (For a torch checkpoint this is conv.weight[:, :, 0, :] permuted.)"""
    cout, cin, k = w.shape
    return jnp.transpose(w, (0, 2, 1)).reshape(cout, k * cin)


def _tap_mask(width, n_valid, ksize, lanes):
    """(K, lanes) 0/1 mask: tap k contributes at flat position r iff r is a real
    position (r < n_valid) and the tap stays inside its own length-`width` row
    (this realizes the 'same' zero padding of the (1, K) conv)."""
    left = (ksize - 1) // 2
    r = np.arange(lanes)
    m = np.zeros((ksize, lanes), np.float32)
    for k in range(ksize):
        pos = (r % width) + (k - left)
        m[k] = ((r < n_valid) & (pos >= 0) & (pos < width)).astype(np.float32)
    return jnp.asarray(m)


def _pool_selectors(r_in, lanes):
    """nn.MaxPool2d((1,2)): even / odd position selection matrices (lanes,lanes)."""
    r_out = r_in // 2
    se = np.zeros((lanes, lanes), np.float32)
    so = np.zeros((lanes, lanes), np.float32)
    j = np.arange(r_out)
    se[2 * j, j] = 1.0
    so[2 * j + 1, j] = 1.0
    return jnp.asarray(se), jnp.asarray(so)


def _upsample_matrix(nh, w_in, w_out, lanes):
    """Bilinear W-upsample (half-pixel centres / align_corners=False, matching
    torchvision Resize for an upscale), block-diagonal over the N*H row groups,
    transposed so that  up = act @ P  with act laid out as (C, lanes)."""
    p = np.zeros((lanes, lanes), np.float32)
    scale = w_in / w_out
    for g in range(nh):
        for wo in range(w_out):
            s = (wo + 0.5) * scale - 0.5
            i0 = int(np.floor(s))
            t = s - i0
            lo = min(max(i0, 0), w_in - 1)
            hi = min(max(i0 + 1, 0), w_in - 1)
            p[g * w_in + lo, g * w_out + wo] += 1.0 - t
            p[g * w_in + hi, g * w_out + wo] += t
    return jnp.asarray(p)


# -----------------------------------------------------------------------------
# Fused forward
# -----------------------------------------------------------------------------
def u_encoder_forward(x_nchw, params, *, kernel_size, pooling_size, depth):
    """Fused forward pass of SalientSleepNet's creat_u_encoder.

    x_nchw : (N, Cin, H, W) float32 (PyTorch layout)
    params : (p0, [p1_0..p1_2], p2, [p3_0..p3_2]) with each
             p = (conv_w (Cout, Cin, K), bn_gamma (Cout,), bn_beta (Cout,)).
             The conv bias is omitted on purpose: training-mode BatchNorm
             subtracts the batch mean right after the conv, so it cancels exactly.
    """
    p0, p1, p2, p3 = params
    N, CIN, H, W = x_nchw.shape
    K = int(kernel_size)
    assert pooling_size == 2, "only pooling_size=2 implemented"
    assert len(p1) == depth - 1 and len(p3) == depth - 1
    NH = N * H
    LANES = NH * W
    assert LANES % 128 == 0, "N*H*W must be a multiple of 128 for this kernel"

    FINAL = p0[0].shape[0]
    MID = p1[0][0].shape[0]

    # spatial widths of the encoder levels, e.g. [16, 8, 4]
    widths = [W // (pooling_size ** d) for d in range(depth - 1)]

    # ---- static constant inputs ---------------------------------------------
    masks = {wd: _tap_mask(wd, NH * wd, K, LANES) for wd in widths}
    pools = [_pool_selectors(NH * widths[d], LANES) for d in range(depth - 2)]
    ups = [_upsample_matrix(NH, widths[d], widths[d - 1], LANES)
           for d in range(depth - 2, 0, -1)]          # in decoder usage order

    def fold(p):
        w, g, b = p
        return (_fold_weight(w.astype(jnp.float32)),
                g.astype(jnp.float32).reshape(-1, 1),
                b.astype(jnp.float32).reshape(-1, 1))

    layers = [fold(p0)] + [fold(q) for q in p1] + [fold(p2)] + [fold(q) for q in p3]
    n_layers = len(layers)                             # 2 + 2*(depth-1) = 8

    # activations as (C, R): channels in sublanes, flattened N*H*W in lanes
    x2d = jnp.transpose(x_nchw, (1, 0, 2, 3)).reshape(CIN, LANES).astype(jnp.float32)

    inputs = [x2d]
    for wm, g, b in layers:
        inputs += [wm, g, b]
    inputs += [masks[wd] for wd in widths]
    for se, so in pools:
        inputs += [se, so]
    inputs += ups

    max_ct = max(CIN, FINAL, 2 * MID)       # widest channel stack fed to a conv

    # -------------------------------------------------------------------------
    def kernel(*refs):
        # unpack (same order as `inputs`, then output, then scratch)
        idx = 0
        x_ref = refs[idx]; idx += 1
        layer_refs = []
        for _ in range(n_layers):
            layer_refs.append(refs[idx:idx + 3]); idx += 3
        mask_refs = {wd: refs[idx + i] for i, wd in enumerate(widths)}
        idx += len(widths)
        pool_refs = [(refs[idx + 2 * i], refs[idx + 2 * i + 1])
                     for i in range(depth - 2)]
        idx += 2 * (depth - 2)
        up_refs = [refs[idx + i] for i in range(depth - 2)]
        idx += depth - 2
        out_ref = refs[idx]
        tap_ref = refs[idx + 1]

        left = (K - 1) // 2

        def conv_bn(parts, width, prm):
            """(1,K) 'same' conv + training-mode BatchNorm2d, fused.
            `parts` are channel-concatenated (C_i, LANES) f32 blocks."""
            w_ref, g_ref, b_ref = prm
            m_ref = mask_refs[width]
            ctot = sum(int(p.shape[0]) for p in parts)
            # (K*Ctot, LANES) tap matrix: K shifted+masked copies of the
            # (concatenated) input stacked along the contraction dim.
            row = 0
            for k in range(K):
                delta = k - left
                m = m_ref[k:k + 1, :]                     # (1, LANES) 0/1
                for p in parts:
                    c = int(p.shape[0])
                    sh = p if delta == 0 else pltpu.roll(p, (-delta) % LANES, axis=1)
                    tap_ref[row:row + c, :] = sh * m
                    row += c
            taps = tap_ref[0:K * ctot, :]
            # one MXU matmul, contraction = K * Ctot
            acc = jnp.dot(w_ref[...], taps, preferred_element_type=jnp.float32)
            # BatchNorm (training mode): one stats pass over the N*H*width real
            # positions (padding lanes of acc are exactly zero), biased variance,
            # eps, folded into a single per-channel scale/shift.
            inv_n = 1.0 / float(NH * width)
            mean = jnp.sum(acc, axis=1, keepdims=True) * inv_n
            ex2 = jnp.sum(acc * acc, axis=1, keepdims=True) * inv_n
            var = ex2 - mean * mean
            scale = g_ref[...] * lax.rsqrt(var + BN_EPS)
            shift = b_ref[...] - mean * scale
            return acc * scale + shift

        # ---------------- encoder ----------------
        x = x_ref[...]
        conv0 = conv_bn([x], W, layer_refs[0])
        cur, cur_w = conv0, W
        skips = []
        pi = 0
        for d in range(depth - 1):
            cur = conv_bn([cur], cur_w, layer_refs[1 + d])
            skips.append((cur, cur_w))
            if d != depth - 2:
                se_ref, so_ref = pool_refs[pi]; pi += 1
                cur = jnp.maximum(
                    jnp.dot(cur, se_ref[...], preferred_element_type=jnp.float32),
                    jnp.dot(cur, so_ref[...], preferred_element_type=jnp.float32))
                cur_w //= 2

        # ---------------- bottleneck ----------------
        cur = conv_bn([cur], cur_w, layer_refs[depth])

        # ---------------- decoder ----------------
        ui = 0
        for d in range(depth - 1, 0, -1):
            skip, skip_w = skips.pop()
            if skip_w != cur_w:                 # bilinear 2x upsample along W
                cur = jnp.dot(cur, up_refs[ui][...],
                              preferred_element_type=jnp.float32)
                ui += 1
                cur_w = skip_w
            # channel concat is folded into the conv's contraction dim
            cur = conv_bn([cur, skip], cur_w, layer_refs[depth + d])

        # ---------------- residual ----------------
        out_ref[...] = (cur + conv0).astype(out_ref.dtype)

    vmem = pl.BlockSpec(memory_space=pltpu.MemorySpace.VMEM)
    out2d = pl.pallas_call(
        kernel,
        out_shape=jax.ShapeDtypeStruct((FINAL, LANES), jnp.float32),
        in_specs=[vmem] * len(inputs),
        out_specs=vmem,
        scratch_shapes=[pltpu.VMEM((K * max_ct, LANES), jnp.float32)],
    )(*inputs)

    # (C, N*H*W) -> (N, C, H, W)
    return jnp.transpose(out2d.reshape(FINAL, N, H, W), (1, 0, 2, 3))


# -----------------------------------------------------------------------------
# Parameter construction (mirrors the PyTorch module structure; conv bias is
# omitted because it is a no-op under training-mode BatchNorm).
# -----------------------------------------------------------------------------
def make_conv_bn_params(key, cin, cout, ksize):
    k1, k2, k3 = jax.random.split(key, 3)
    w = 0.1 * jax.random.normal(k1, (cout, cin, ksize), jnp.float32)
    gamma = 1.0 + 0.1 * jax.random.normal(k2, (cout,), jnp.float32)
    beta = 0.1 * jax.random.normal(k3, (cout,), jnp.float32)
    return (w, gamma, beta)


def make_u_encoder_params(key, cin, final_filter, middle, ksize):
    keys = jax.random.split(key, 8)
    p0 = make_conv_bn_params(keys[0], cin, final_filter, ksize)
    p1 = [make_conv_bn_params(keys[1], final_filter, middle, ksize),
          make_conv_bn_params(keys[2], middle, middle, ksize),
          make_conv_bn_params(keys[3], middle, middle, ksize)]
    p2 = make_conv_bn_params(keys[4], middle, middle, ksize)
    p3 = [make_conv_bn_params(keys[5], 2 * middle, final_filter, ksize),
          make_conv_bn_params(keys[6], 2 * middle, middle, ksize),
          make_conv_bn_params(keys[7], 2 * middle, middle, ksize)]
    return (p0, p1, p2, p3)


if __name__ == "__main__":
    # creat_u_encoder(input=4, final_filter=8, kernel_size=5, pooling_size=2,
    #                 middle_layer_filter=6, depth=4, padding='same')
    N, CIN, H, W = 2, 4, 4, 16          # PyTorch NCHW input shape
    FINAL, MIDDLE, K, POOL, DEPTH = 8, 6, 5, 2, 4

    key = jax.random.PRNGKey(0)
    kx, kp = jax.random.split(key)
    x_nchw = jax.random.normal(kx, (N, CIN, H, W), jnp.float32)
    params = make_u_encoder_params(kp, CIN, FINAL, MIDDLE, K)

    fwd = jax.jit(lambda x, p: u_encoder_forward(
        x, p, kernel_size=K, pooling_size=POOL, depth=DEPTH))
    out_nchw = fwd(x_nchw, params)
    jax.block_until_ready(out_nchw)

    assert out_nchw.shape == (N, FINAL, H, W), out_nchw.shape
    print("KERNEL_OK")
</pallas_src>

<mosaic_0001>
module attributes {stable_mosaic.version = 11 : i64} {
  func.func @kernel(%arg0: memref<4x128xf32, #tpu.memory_space<vmem>>, %arg1: memref<8x20xf32, #tpu.memory_space<vmem>>, %arg2: memref<8x1xf32, #tpu.memory_space<vmem>>, %arg3: memref<8x1xf32, #tpu.memory_space<vmem>>, %arg4: memref<6x40xf32, #tpu.memory_space<vmem>>, %arg5: memref<6x1xf32, #tpu.memory_space<vmem>>, %arg6: memref<6x1xf32, #tpu.memory_space<vmem>>, %arg7: memref<6x30xf32, #tpu.memory_space<vmem>>, %arg8: memref<6x1xf32, #tpu.memory_space<vmem>>, %arg9: memref<6x1xf32, #tpu.memory_space<vmem>>, %arg10: memref<6x30xf32, #tpu.memory_space<vmem>>, %arg11: memref<6x1xf32, #tpu.memory_space<vmem>>, %arg12: memref<6x1xf32, #tpu.memory_space<vmem>>, %arg13: memref<6x30xf32, #tpu.memory_space<vmem>>, %arg14: memref<6x1xf32, #tpu.memory_space<vmem>>, %arg15: memref<6x1xf32, #tpu.memory_space<vmem>>, %arg16: memref<8x60xf32, #tpu.memory_space<vmem>>, %arg17: memref<8x1xf32, #tpu.memory_space<vmem>>, %arg18: memref<8x1xf32, #tpu.memory_space<vmem>>, %arg19: memref<6x60xf32, #tpu.memory_space<vmem>>, %arg20: memref<6x1xf32, #tpu.memory_space<vmem>>, %arg21: memref<6x1xf32, #tpu.memory_space<vmem>>, %arg22: memref<6x60xf32, #tpu.memory_space<vmem>>, %arg23: memref<6x1xf32, #tpu.memory_space<vmem>>, %arg24: memref<6x1xf32, #tpu.memory_space<vmem>>, %arg25: memref<5x128xf32, #tpu.memory_space<vmem>>, %arg26: memref<5x128xf32, #tpu.memory_space<vmem>>, %arg27: memref<5x128xf32, #tpu.memory_space<vmem>>, %arg28: memref<128x128xf32, #tpu.memory_space<vmem>>, %arg29: memref<128x128xf32, #tpu.memory_space<vmem>>, %arg30: memref<128x128xf32, #tpu.memory_space<vmem>>, %arg31: memref<128x128xf32, #tpu.memory_space<vmem>>, %arg32: memref<128x128xf32, #tpu.memory_space<vmem>>, %arg33: memref<128x128xf32, #tpu.memory_space<vmem>>, %arg34: memref<8x128xf32, #tpu.memory_space<vmem>>, %arg35: memref<60x128xf32, #tpu.memory_space<vmem>>) attributes {dimension_semantics = [], scalar_prefetch = 0 : i64, scratch_operands = 1 : i64, tpu.core_type = #tpu.core_type<tc>} {
    %c0 = arith.constant 0 : index
    %c0_0 = arith.constant 0 : index
    %0 = vector.load %arg0[%c0, %c0_0] : memref<4x128xf32, #tpu.memory_space<vmem>>, vector<4x128xf32>
    %c0_1 = arith.constant 0 : index
    %c0_2 = arith.constant 0 : index
    %1 = vector.load %arg25[%c0_1, %c0_2] : memref<5x128xf32, #tpu.memory_space<vmem>>, vector<1x128xf32>
    %c2_i32 = arith.constant 2 : i32
    %2 = tpu.dynamic_rotate %0 by %c2_i32 dim 1 : vector<4x128xf32>, i32 -> vector<4x128xf32>
    %3 = vector.broadcast %1 : vector<1x128xf32> to vector<4x128xf32>
    %4 = arith.mulf %2, %3 : vector<4x128xf32>
    %c0_3 = arith.constant 0 : index
    %c0_4 = arith.constant 0 : index
    %5 = vector.load %arg35[%c0_3, %c0_4] : memref<60x128xf32, #tpu.memory_space<vmem>>, vector<4x128xf32>
    tpu.vector_store %arg35[%c0_3, %c0_4], %4 {strides = array<i32>} : memref<60x128xf32, #tpu.memory_space<vmem>>, vector<4x128xf32>,
    %c1 = arith.constant 1 : index
    %c0_5 = arith.constant 0 : index
    %6 = vector.load %arg25[%c1, %c0_5] : memref<5x128xf32, #tpu.memory_space<vmem>>, vector<1x128xf32>
    %c1_i32 = arith.constant 1 : i32
    %7 = tpu.dynamic_rotate %0 by %c1_i32 dim 1 : vector<4x128xf32>, i32 -> vector<4x128xf32>
    %8 = vector.broadcast %6 : vector<1x128xf32> to vector<4x128xf32>
    %9 = arith.mulf %7, %8 : vector<4x128xf32>
    %c4 = arith.constant 4 : index
    %c0_6 = arith.constant 0 : index
    %10 = vector.load %arg35[%c4, %c0_6] : memref<60x128xf32, #tpu.memory_space<vmem>>, vector<4x128xf32>
    tpu.vector_store %arg35[%c4, %c0_6], %9 {strides = array<i32>} : memref<60x128xf32, #tpu.memory_space<vmem>>, vector<4x128xf32>,
    %c2 = arith.constant 2 : index
    %c0_7 = arith.constant 0 : index
    %11 = vector.load %arg25[%c2, %c0_7] : memref<5x128xf32, #tpu.memory_space<vmem>>, vector<1x128xf32>
    %12 = vector.broadcast %11 : vector<1x128xf32> to vector<4x128xf32>
    %13 = arith.mulf %0, %12 : vector<4x128xf32>
    %c8 = arith.constant 8 : index
    %c0_8 = arith.constant 0 : index
    %14 = vector.load %arg35[%c8, %c0_8] : memref<60x128xf32, #tpu.memory_space<vmem>>, vector<4x128xf32>
    tpu.vector_store %arg35[%c8, %c0_8], %13 {strides = array<i32>} : memref<60x128xf32, #tpu.memory_space<vmem>>, vector<4x128xf32>,
    %c3 = arith.constant 3 : index
    %c0_9 = arith.constant 0 : index
    %15 = vector.load %arg25[%c3, %c0_9] : memref<5x128xf32, #tpu.memory_space<vmem>>, vector<1x128xf32>
    %c127_i32 = arith.constant 127 : i32
    %16 = tpu.dynamic_rotate %0 by %c127_i32 dim 1 : vector<4x128xf32>, i32 -> vector<4x128xf32>
    %17 = vector.broadcast %15 : vector<1x128xf32> to vector<4x128xf32>
    %18 = arith.mulf %16, %17 : vector<4x128xf32>
    %c12 = arith.constant 12 : index
    %c0_10 = arith.constant 0 : index
    %19 = vector.load %arg35[%c12, %c0_10] : memref<60x128xf32, #tpu.memory_space<vmem>>, vector<4x128xf32>
    tpu.vector_store %arg35[%c12, %c0_10], %18 {strides = array<i32>} : memref<60x128xf32, #tpu.memory_space<vmem>>, vector<4x128xf32>,
    %c4_11 = arith.constant 4 : index
    %c0_12 = arith.constant 0 : index
    %20 = vector.load %arg25[%c4_11, %c0_12] : memref<5x128xf32, #tpu.memory_space<vmem>>, vector<1x128xf32>
    %c126_i32 = arith.constant 126 : i32
    %21 = tpu.dynamic_rotate %0 by %c126_i32 dim 1 : vector<4x128xf32>, i32 -> vector<4x128xf32>
    %22 = vector.broadcast %20 : vector<1x128xf32> to vector<4x128xf32>
    %23 = arith.mulf %21, %22 : vector<4x128xf32>
    %c16 = arith.constant 16 : index
    %c0_13 = arith.constant 0 : index
    %24 = vector.load %arg35[%c16, %c0_13] : memref<60x128xf32, #tpu.memory_space<vmem>>, vector<4x128xf32>
    tpu.vector_store %arg35[%c16, %c0_13], %23 {strides = array<i32>} : memref<60x128xf32, #tpu.memory_space<vmem>>, vector<4x128xf32>,
    %c0_14 = arith.constant 0 : index
    %c0_15 = arith.constant 0 : index
    %25 = vector.load %arg35[%c0_14, %c0_15] : memref<60x128xf32, #tpu.memory_space<vmem>>, vector<20x128xf32>
    %c0_16 = arith.constant 0 : index
    %c0_17 = arith.constant 0 : index
    %26 = vector.load %arg1[%c0_16, %c0_17] : memref<8x20xf32, #tpu.memory_space<vmem>>, vector<8x20xf32>
    %cst = arith.constant dense<0.000000e+00> : vector<8x128xf32>
    %27 = tpu.matmul %26, %25, %cst {dimension_numbers = #tpu.dot_dimension_numbers<[1], [0], [0], [1], [0, 0, 1, 1], [], []>} : vector<8x20xf32>, vector<20x128xf32>, vector<8x128xf32> -> vector<8x128xf32>
    %cst_18 = arith.constant dense<0.000000e+00> : vector<8xf32>
    %28 = vector.multi_reduction <add>, %27, %cst_18 [1] : vector<8x128xf32> to vector<8xf32>
    %29 = vector.shape_cast %28 : vector<8xf32> to vector<8x1xf32>
    %cst_19 = arith.constant 7.812500e-03 : f32
    %30 = vector.broadcast %cst_19 : f32 to vector<8x1xf32>
    %31 = arith.mulf %29, %30 : vector<8x1xf32>
    %32 = arith.mulf %27, %27 : vector<8x128xf32>
    %cst_20 = arith.constant dense<0.000000e+00> : vector<8xf32>
    %33 = vector.multi_reduction <add>, %32, %cst_20 [1] : vector<8x128xf32> to vector<8xf32>
    %34 = vector.shape_cast %33 : vector<8xf32> to vector<8x1xf32>
    %cst_21 = arith.constant 7.812500e-03 : f32
    %35 = vector.broadcast %cst_21 : f32 to vector<8x1xf32>
    %36 = arith.mulf %34, %35 : vector<8x1xf32>
    %37 = arith.mulf %31, %31 : vector<8x1xf32>
    %38 = arith.subf %36, %37 : vector<8x1xf32>
    %c0_22 = arith.constant 0 : index
    %c0_23 = arith.constant 0 : index
    %39 = vector.load %arg2[%c0_22, %c0_23] : memref<8x1xf32, #tpu.memory_space<vmem>>, vector<8x1xf32>
    %cst_24 = arith.constant 9.99999974E-6 : f32
    %40 = vector.broadcast %cst_24 : f32 to vector<8x1xf32>
    %41 = arith.addf %38, %40 : vector<8x1xf32>
    %42 = math.rsqrt %41 : vector<8x1xf32>
    %43 = arith.mulf %39, %42 : vector<8x1xf32>
    %c0_25 = arith.constant 0 : index
    %c0_26 = arith.constant 0 : index
    %44 = vector.load %arg3[%c0_25, %c0_26] : memref<8x1xf32, #tpu.memory_space<vmem>>, vector<8x1xf32>
    %45 = arith.mulf %31, %43 : vector<8x1xf32>
    %46 = arith.subf %44, %45 : vector<8x1xf32>
    %47 = vector.broadcast %43 : vector<8x1xf32> to vector<8x128xf32>
    %48 = arith.mulf %27, %47 : vector<8x128xf32>
    %49 = vector.broadcast %46 : vector<8x1xf32> to vector<8x128xf32>
    %50 = arith.addf %48, %49 : vector<8x128xf32>
    %c0_27 = arith.constant 0 : index
    %c0_28 = arith.constant 0 : index
    %51 = vector.load %arg25[%c0_27, %c0_28] : memref<5x128xf32, #tpu.memory_space<vmem>>, vector<1x128xf32>
    %c2_i32_29 = arith.constant 2 : i32
    %52 = tpu.dynamic_rotate %50 by %c2_i32_29 dim 1 : vector<8x128xf32>, i32 -> vector<8x128xf32>
    %53 = vector.broadcast %51 : vector<1x128xf32> to vector<8x128xf32>
    %54 = arith.mulf %52, %53 : vector<8x128xf32>
    %c0_30 = arith.constant 0 : index
    %c0_31 = arith.constant 0 : index
    %55 = vector.load %arg35[%c0_30, %c0_31] : memref<60x128xf32, #tpu.memory_space<vmem>>, vector<8x128xf32>
    tpu.vector_store %arg35[%c0_30, %c0_31], %54 {strides = array<i32>} : memref<60x128xf32, #tpu.memory_space<vmem>>, vector<8x128xf32>,
    %c1_32 = arith.constant 1 : index
    %c0_33 = arith.constant 0 : index
    %56 = vector.load %arg25[%c1_32, %c0_33] : memref<5x128xf32, #tpu.memory_space<vmem>>, vector<1x128xf32>
    %c1_i32_34 = arith.constant 1 : i32
    %57 = tpu.dynamic_rotate %50 by %c1_i32_34 dim 1 : vector<8x128xf32>, i32 -> vector<8x128xf32>
    %58 = vector.broadcast %56 : vector<1x128xf32> to vector<8x128xf32>
    %59 = arith.mulf %57, %58 : vector<8x128xf32>
    %c8_35 = arith.constant 8 : index
    %c0_36 = arith.constant 0 : index
    %60 = vector.load %arg35[%c8_35, %c0_36] : memref<60x128xf32, #tpu.memory_space<vmem>>, vector<8x128xf32>
    tpu.vector_store %arg35[%c8_35, %c0_36], %59 {strides = array<i32>} : memref<60x128xf32, #tpu.memory_space<vmem>>, vector<8x128xf32>,
    %c2_37 = arith.constant 2 : index
    %c0_38 = arith.constant 0 : index
    %61 = vector.load %arg25[%c2_37, %c0_38] : memref<5x128xf32, #tpu.memory_space<vmem>>, vector<1x128xf32>
    %62 = vector.broadcast %61 : vector<1x128xf32> to vector<8x128xf32>
    %63 = arith.mulf %50, %62 : vector<8x128xf32>
    %c16_39 = arith.constant 16 : index
    %c0_40 = arith.constant 0 : index
    %64 = vector.load %arg35[%c16_39, %c0_40] : memref<60x128xf32, #tpu.memory_space<vmem>>, vector<8x128xf32>
    tpu.vector_store %arg35[%c16_39, %c0_40], %63 {strides = array<i32>} : memref<60x128xf32, #tpu.memory_space<vmem>>, vector<8x128xf32>,
    %c3_41 = arith.constant 3 : index
    %c0_42 = arith.constant 0 : index
    %65 = vector.load %arg25[%c3_41, %c0_42] : memref<5x128xf32, #tpu.memory_space<vmem>>, vector<1x128xf32>
    %c127_i32_43 = arith.constant 127 : i32
    %66 = tpu.dynamic_rotate %50 by %c127_i32_43 dim 1 : vector<8x128xf32>, i32 -> vector<8x128xf32>
    %67 = vector.broadcast %65 : vector<1x128xf32> to vector<8x128xf32>
    %68 = arith.mulf %66, %67 : vector<8x128xf32>
    %c24 = arith.constant 24 : index
    %c0_44 = arith.constant 0 : index
    %69 = vector.load %arg35[%c24, %c0_44] : memref<60x128xf32, #tpu.memory_space<vmem>>, vector<8x128xf32>
    tpu.vector_store %arg35[%c24, %c0_44], %68 {strides = array<i32>} : memref<60x128xf32, #tpu.memory_space<vmem>>, vector<8x128xf32>,
    %c4_45 = arith.constant 4 : index
    %c0_46 = arith.constant 0 : index
    %70 = vector.load %arg25[%c4_45, %c0_46] : memref<5x128xf32, #tpu.memory_space<vmem>>, vector<1x128xf32>
    %c126_i32_47 = arith.constant 126 : i32
    %71 = tpu.dynamic_rotate %50 by %c126_i32_47 dim 1 : vector<8x128xf32>, i32 -> vector<8x128xf32>
    %72 = vector.broadcast %70 : vector<1x128xf32> to vector<8x128xf32>
    %73 = arith.mulf %71, %72 : vector<8x128xf32>
    %c32 = arith.constant 32 : index
    %c0_48 = arith.constant 0 : index
    %74 = vector.load %arg35[%c32, %c0_48] : memref<60x128xf32, #tpu.memory_space<vmem>>, vector<8x128xf32>
    tpu.vector_store %arg35[%c32, %c0_48], %73 {strides = array<i32>} : memref<60x128xf32, #tpu.memory_space<vmem>>, vector<8x128xf32>,
    %c0_49 = arith.constant 0 : index
    %c0_50 = arith.constant 0 : index
    %75 = vector.load %arg35[%c0_49, %c0_50] : memref<60x128xf32, #tpu.memory_space<vmem>>, vector<40x128xf32>
    %c0_51 = arith.constant 0 : index
    %c0_52 = arith.constant 0 : index
    %76 = vector.load %arg4[%c0_51, %c0_52] : memref<6x40xf32, #tpu.memory_space<vmem>>, vector<6x40xf32>
    %cst_53 = arith.constant dense<0.000000e+00> : vector<6x128xf32>
    %77 = tpu.matmul %76, %75, %cst_53 {dimension_numbers = #tpu.dot_dimension_numbers<[1], [0], [0], [1], [0, 0, 1, 1], [], []>} : vector<6x40xf32>, vector<40x128xf32>, vector<6x128xf32> -> vector<6x128xf32>
    %cst_54 = arith.constant dense<0.000000e+00> : vector<6xf32>
    %78 = vector.multi_reduction <add>, %77, %cst_54 [1] : vector<6x128xf32> to vector<6xf32>
    %79 = vector.shape_cast %78 : vector<6xf32> to vector<6x1xf32>
    %cst_55 = arith.constant 7.812500e-03 : f32
    %80 = vector.broadcast %cst_55 : f32 to vector<6x1xf32>
    %81 = arith.mulf %79, %80 : vector<6x1xf32>
    %82 = arith.mulf %77, %77 : vector<6x128xf32>
    %cst_56 = arith.constant dense<0.000000e+00> : vector<6xf32>
    %83 = vector.multi_reduction <add>, %82, %cst_56 [1] : vector<6x128xf32> to vector<6xf32>
    %84 = vector.shape_cast %83 : vector<6xf32> to vector<6x1xf32>
    %cst_57 = arith.constant 7.812500e-03 : f32
    %85 = vector.broadcast %cst_57 : f32 to vector<6x1xf32>
    %86 = arith.mulf %84, %85 : vector<6x1xf32>
    %87 = arith.mulf %81, %81 : vector<6x1xf32>
    %88 = arith.subf %86, %87 : vector<6x1xf32>
    %c0_58 = arith.constant 0 : index
    %c0_59 = arith.constant 0 : index
    %89 = vector.load %arg5[%c0_58, %c0_59] : memref<6x1xf32, #tpu.memory_space<vmem>>, vector<6x1xf32>
    %cst_60 = arith.constant 9.99999974E-6 : f32
    %90 = vector.broadcast %cst_60 : f32 to vector<6x1xf32>
    %91 = arith.addf %88, %90 : vector<6x1xf32>
    %92 = math.rsqrt %91 : vector<6x1xf32>
    %93 = arith.mulf %89, %92 : vector<6x1xf32>
    %c0_61 = arith.constant 0 : index
    %c0_62 = arith.constant 0 : index
    %94 = vector.load %arg6[%c0_61, %c0_62] : memref<6x1xf32, #tpu.memory_space<vmem>>, vector<6x1xf32>
    %95 = arith.mulf %81, %93 : vector<6x1xf32>
    %96 = arith.subf %94, %95 : vector<6x1xf32>
    %97 = vector.broadcast %93 : vector<6x1xf32> to vector<6x128xf32>
    %98 = arith.mulf %77, %97 : vector<6x128xf32>
    %99 = vector.broadcast %96 : vector<6x1xf32> to vector<6x128xf32>
    %100 = arith.addf %98, %99 : vector<6x128xf32>
    %c0_63 = arith.constant 0 : index
    %c0_64 = arith.constant 0 : index
    %101 = vector.load %arg28[%c0_63, %c0_64] : memref<128x128xf32, #tpu.memory_space<vmem>>, vector<128x128xf32>
    %cst_65 = arith.constant dense<0.000000e+00> : vector<6x128xf32>
    %102 = tpu.matmul %100, %101, %cst_65 {dimension_numbers = #tpu.dot_dimension_numbers<[1], [0], [0], [1], [0, 0, 1, 1], [], []>} : vector<6x128xf32>, vector<128x128xf32>, vector<6x128xf32> -> vector<6x128xf32>
    %c0_66 = arith.constant 0 : index
    %c0_67 = arith.constant 0 : index
    %103 = vector.load %arg29[%c0_66, %c0_67] : memref<128x128xf32, #tpu.memory_space<vmem>>, vector<128x128xf32>
    %cst_68 = arith.constant dense<0.000000e+00> : vector<6x128xf32>
    %104 = tpu.matmul %100, %103, %cst_68 {dimension_numbers = #tpu.dot_dimension_numbers<[1], [0], [0], [1], [0, 0, 1, 1], [], []>} : vector<6x128xf32>, vector<128x128xf32>, vector<6x128xf32> -> vector<6x128xf32>
    %105 = arith.maximumf %102, %104 : vector<6x128xf32>
    %c0_69 = arith.constant 0 : index
    %c0_70 = arith.constant 0 : index
    %106 = vector.load %arg26[%c0_69, %c0_70] : memref<5x128xf32, #tpu.memory_space<vmem>>, vector<1x128xf32>
    %c2_i32_71 = arith.constant 2 : i32
    %107 = tpu.dynamic_rotate %105 by %c2_i32_71 dim 1 : vector<6x128xf32>, i32 -> vector<6x128xf32>
    %108 = vector.broadcast %106 : vector<1x128xf32> to vector<6x128xf32>
    %109 = arith.mulf %107, %108 : vector<6x128xf32>
    %c0_72 = arith.constant 0 : index
    %c0_73 = arith.constant 0 : index
    %110 = vector.load %arg35[%c0_72, %c0_73] : memref<60x128xf32, #tpu.memory_space<vmem>>, vector<6x128xf32>
    tpu.vector_store %arg35[%c0_72, %c0_73], %109 {strides = array<i32>} : memref<60x128xf32, #tpu.memory_space<vmem>>, vector<6x128xf32>,
    %c1_74 = arith.constant 1 : index
    %c0_75 = arith.constant 0 : index
    %111 = vector.load %arg26[%c1_74, %c0_75] : memref<5x128xf32, #tpu.memory_space<vmem>>, vector<1x128xf32>
    %c1_i32_76 = arith.constant 1 : i32
    %112 = tpu.dynamic_rotate %105 by %c1_i32_76 dim 1 : vector<6x128xf32>, i32 -> vector<6x128xf32>
    %113 = vector.broadcast %111 : vector<1x128xf32> to vector<6x128xf32>
    %114 = arith.mulf %112, %113 : vector<6x128xf32>
    %c6 = arith.constant 6 : index
    %c0_77 = arith.constant 0 : index
    %115 = vector.load %arg35[%c6, %c0_77] : memref<60x128xf32, #tpu.memory_space<vmem>>, vector<6x128xf32>
    tpu.vector_store %arg35[%c6, %c0_77], %114 {strides = array<i32>} : memref<60x128xf32, #tpu.memory_space<vmem>>, vector<6x128xf32>,
    %c2_78 = arith.constant 2 : index
    %c0_79 = arith.constant 0 : index
    %116 = vector.load %arg26[%c2_78, %c0_79] : memref<5x128xf32, #tpu.memory_space<vmem>>, vector<1x128xf32>
    %117 = vector.broadcast %116 : vector<1x128xf32> to vector<6x128xf32>
    %118 = arith.mulf %105, %117 : vector<6x128xf32>
    %c12_80 = arith.constant 12 : index
    %c0_81 = arith.constant 0 : index
    %119 = vector.load %arg35[%c12_80, %c0_81] : memref<60x128xf32, #tpu.memory_space<vmem>>, vector<6x128xf32>
    tpu.vector_store %arg35[%c12_80, %c0_81], %118 {strides = array<i32>} : memref<60x128xf32, #tpu.memory_space<vmem>>, vector<6x128xf32>,
    %c3_82 = arith.constant 3 : index
    %c0_83 = arith.constant 0 : index
    %120 = vector.load %arg26[%c3_82, %c0_83] : memref<5x128xf32, #tpu.memory_space<vmem>>, vector<1x128xf32>
    %c127_i32_84 = arith.constant 127 : i32
    %121 = tpu.dynamic_rotate %105 by %c127_i32_84 dim 1 : vector<6x128xf32>, i32 -> vector<6x128xf32>
    %122 = vector.broadcast %120 : vector<1x128xf32> to vector<6x128xf32>
    %123 = arith.mulf %121, %122 : vector<6x128xf32>
    %c18 = arith.constant 18 : index
    %c0_85 = arith.constant 0 : index
    %124 = vector.load %arg35[%c18, %c0_85] : memref<60x128xf32, #tpu.memory_space<vmem>>, vector<6x128xf32>
    tpu.vector_store %arg35[%c18, %c0_85], %123 {strides = array<i32>} : memref<60x128xf32, #tpu.memory_space<vmem>>, vector<6x128xf32>,
    %c4_86 = arith.constant 4 : index
    %c0_87 = arith.constant 0 : index
    %125 = vector.load %arg26[%c4_86, %c0_87] : memref<5x128xf32, #tpu.memory_space<vmem>>, vector<1x128xf32>
    %c126_i32_88 = arith.constant 126 : i32
    %126 = tpu.dynamic_rotate %105 by %c126_i32_88 dim 1 : vector<6x128xf32>, i32 -> vector<6x128xf32>
    %127 = vector.broadcast %125 : vector<1x128xf32> to vector<6x128xf32>
    %128 = arith.mulf %126, %127 : vector<6x128xf32>
    %c24_89 = arith.constant 24 : index
    %c0_90 = arith.constant 0 : index
    %129 = vector.load %arg35[%c24_89, %c0_90] : memref<60x128xf32, #tpu.memory_space<vmem>>, vector<6x128xf32>
    tpu.vector_store %arg35[%c24_89, %c0_90], %128 {strides = array<i32>} : memref<60x128xf32, #tpu.memory_space<vmem>>, vector<6x128xf32>,
    %c0_91 = arith.constant 0 : index
    %c0_92 = arith.constant 0 : index
    %130 = vector.load %arg35[%c0_91, %c0_92] : memref<60x128xf32, #tpu.memory_space<vmem>>, vector<30x128xf32>
    %c0_93 = arith.constant 0 : index
    %c0_94 = arith.constant 0 : index
    %131 = vector.load %arg7[%c0_93, %c0_94] : memref<6x30xf32, #tpu.memory_space<vmem>>, vector<6x30xf32>
    %cst_95 = arith.constant dense<0.000000e+00> : vector<6x128xf32>
    %132 = tpu.matmul %131, %130, %cst_95 {dimension_numbers = #tpu.dot_dimension_numbers<[1], [0], [0], [1], [0, 0, 1, 1], [], []>} : vector<6x30xf32>, vector<30x128xf32>, vector<6x128xf32> -> vector<6x128xf32>
    %cst_96 = arith.constant dense<0.000000e+00> : vector<6xf32>
    %133 = vector.multi_reduction <add>, %132, %cst_96 [1] : vector<6x128xf32> to vector<6xf32>
    %134 = vector.shape_cast %133 : vector<6xf32> to vector<6x1xf32>
    %cst_97 = arith.constant 1.562500e-02 : f32
    %135 = vector.broadcast %cst_97 : f32 to vector<6x1xf32>
    %136 = arith.mulf %134, %135 : vector<6x1xf32>
    %137 = arith.mulf %132, %132 : vector<6x128xf32>
    %cst_98 = arith.constant dense<0.000000e+00> : vector<6xf32>
    %138 = vector.multi_reduction <add>, %137, %cst_98 [1] : vector<6x128xf32> to vector<6xf32>
    %139 = vector.shape_cast %138 : vector<6xf32> to vector<6x1xf32>
    %cst_99 = arith.constant 1.562500e-02 : f32
    %140 = vector.broadcast %cst_99 : f32 to vector<6x1xf32>
    %141 = arith.mulf %139, %140 : vector<6x1xf32>
    %142 = arith.mulf %136, %136 : vector<6x1xf32>
    %143 = arith.subf %141, %142 : vector<6x1xf32>
    %c0_100 = arith.constant 0 : index
    %c0_101 = arith.constant 0 : index
    %144 = vector.load %arg8[%c0_100, %c0_101] : memref<6x1xf32, #tpu.memory_space<vmem>>, vector<6x1xf32>
    %cst_102 = arith.constant 9.99999974E-6 : f32
    %145 = vector.broadcast %cst_102 : f32 to vector<6x1xf32>
    %146 = arith.addf %143, %145 : vector<6x1xf32>
    %147 = math.rsqrt %146 : vector<6x1xf32>
    %148 = arith.mulf %144, %147 : vector<6x1xf32>
    %c0_103 = arith.constant 0 : index
    %c0_104 = arith.constant 0 : index
    %149 = vector.load %arg9[%c0_103, %c0_104] : memref<6x1xf32, #tpu.memory_space<vmem>>, vector<6x1xf32>
    %150 = arith.mulf %136, %148 : vector<6x1xf32>
    %151 = arith.subf %149, %150 : vector<6x1xf32>
    %152 = vector.broadcast %148 : vector<6x1xf32> to vector<6x128xf32>
    %153 = arith.mulf %132, %152 : vector<6x128xf32>
    %154 = vector.broadcast %151 : vector<6x1xf32> to vector<6x128xf32>
    %155 = arith.addf %153, %154 : vector<6x128xf32>
    %c0_105 = arith.constant 0 : index
    %c0_106 = arith.constant 0 : index
    %156 = vector.load %arg30[%c0_105, %c0_106] : memref<128x128xf32, #tpu.memory_space<vmem>>, vector<128x128xf32>
    %cst_107 = arith.constant dense<0.000000e+00> : vector<6x128xf32>
    %157 = tpu.matmul %155, %156, %cst_107 {dimension_numbers = #tpu.dot_dimension_numbers<[1], [0], [0], [1], [0, 0, 1, 1], [], []>} : vector<6x128xf32>, vector<128x128xf32>, vector<6x128xf32> -> vector<6x128xf32>
    %c0_108 = arith.constant 0 : index
    %c0_109 = arith.constant 0 : index
    %158 = vector.load %arg31[%c0_108, %c0_109] : memref<128x128xf32, #tpu.memory_space<vmem>>, vector<128x128xf32>
    %cst_110 = arith.constant dense<0.000000e+00> : vector<6x128xf32>
    %159 = tpu.matmul %155, %158, %cst_110 {dimension_numbers = #tpu.dot_dimension_numbers<[1], [0], [0], [1], [0, 0, 1, 1], [], []>} : vector<6x128xf32>, vector<128x128xf32>, vector<6x128xf32> -> vector<6x128xf32>
    %160 = arith.maximumf %157, %159 : vector<6x128xf32>
    %c0_111 = arith.constant 0 : index
    %c0_112 = arith.constant 0 : index
    %161 = vector.load %arg27[%c0_111, %c0_112] : memref<5x128xf32, #tpu.memory_space<vmem>>, vector<1x128xf32>
    %c2_i32_113 = arith.constant 2 : i32
    %162 = tpu.dynamic_rotate %160 by %c2_i32_113 dim 1 : vector<6x128xf32>, i32 -> vector<6x128xf32>
    %163 = vector.broadcast %161 : vector<1x128xf32> to vector<6x128xf32>
    %164 = arith.mulf %162, %163 : vector<6x128xf32>
    %c0_114 = arith.constant 0 : index
    %c0_115 = arith.constant 0 : index
    %165 = vector.load %arg35[%c0_114, %c0_115] : memref<60x128xf32, #tpu.memory_space<vmem>>, vector<6x128xf32>
    tpu.vector_store %arg35[%c0_114, %c0_115], %164 {strides = array<i32>} : memref<60x128xf32, #tpu.memory_space<vmem>>, vector<6x128xf32>,
    %c1_116 = arith.constant 1 : index
    %c0_117 = arith.constant 0 : index
    %166 = vector.load %arg27[%c1_116, %c0_117] : memref<5x128xf32, #tpu.memory_space<vmem>>, vector<1x128xf32>
    %c1_i32_118 = arith.constant 1 : i32
    %167 = tpu.dynamic_rotate %160 by %c1_i32_118 dim 1 : vector<6x128xf32>, i32 -> vector<6x128xf32>
    %168 = vector.broadcast %166 : vector<1x128xf32> to vector<6x128xf32>
    %169 = arith.mulf %167, %168 : vector<6x128xf32>
    %c6_119 = arith.constant 6 : index
    %c0_120 = arith.constant 0 : index
    %170 = vector.load %arg35[%c6_119, %c0_120] : memref<60x128xf32, #tpu.memory_space<vmem>>, vector<6x128xf32>
    tpu.vector_store %arg35[%c6_119, %c0_120], %169 {strides = array<i32>} : memref<60x128xf32, #tpu.memory_space<vmem>>, vector<6x128xf32>,
    %c2_121 = arith.constant 2 : index
    %c0_122 = arith.constant 0 : index
    %171 = vector.load %arg27[%c2_121, %c0_122] : memref<5x128xf32, #tpu.memory_space<vmem>>, vector<1x128xf32>
    %172 = vector.broadcast %171 : vector<1x128xf32> to vector<6x128xf32>
    %173 = arith.mulf %160, %172 : vector<6x128xf32>
    %c12_123 = arith.constant 12 : index
    %c0_124 = arith.constant 0 : index
    %174 = vector.load %arg35[%c12_123, %c0_124] : memref<60x128xf32, #tpu.memory_space<vmem>>, vector<6x128xf32>
    tpu.vector_store %arg35[%c12_123, %c0_124], %173 {strides = array<i32>} : memref<60x128xf32, #tpu.memory_space<vmem>>, vector<6x128xf32>,
    %c3_125 = arith.constant 3 : index
    %c0_126 = arith.constant 0 : index
    %175 = vector.load %arg27[%c3_125, %c0_126] : memref<5x128xf32, #tpu.memory_space<vmem>>, vector<1x128xf32>
    %c127_i32_127 = arith.constant 127 : i32
    %176 = tpu.dynamic_rotate %160 by %c127_i32_127 dim 1 : vector<6x128xf32>, i32 -> vector<6x128xf32>
    %177 = vector.broadcast %175 : vector<1x128xf32> to vector<6x128xf32>
    %178 = arith.mulf %176, %177 : vector<6x128xf32>
    %c18_128 = arith.constant 18 : index
    %c0_129 = arith.constant 0 : index
    %179 = vector.load %arg35[%c18_128, %c0_129] : memref<60x128xf32, #tpu.memory_space<vmem>>, vector<6x128xf32>
    tpu.vector_store %arg35[%c18_128, %c0_129], %178 {strides = array<i32>} : memref<60x128xf32, #tpu.memory_space<vmem>>, vector<6x128xf32>,
    %c4_130 = arith.constant 4 : index
    %c0_131 = arith.constant 0 : index
    %180 = vector.load %arg27[%c4_130, %c0_131] : memref<5x128xf32, #tpu.memory_space<vmem>>, vector<1x128xf32>
    %c126_i32_132 = arith.constant 126 : i32
    %181 = tpu.dynamic_rotate %160 by %c126_i32_132 dim 1 : vector<6x128xf32>, i32 -> vector<6x128xf32>
    %182 = vector.broadcast %180 : vector<1x128xf32> to vector<6x128xf32>
    %183 = arith.mulf %181, %182 : vector<6x128xf32>
    %c24_133 = arith.constant 24 : index
    %c0_134 = arith.constant 0 : index
    %184 = vector.load %arg35[%c24_133, %c0_134] : memref<60x128xf32, #tpu.memory_space<vmem>>, vector<6x128xf32>
    tpu.vector_store %arg35[%c24_133, %c0_134], %183 {strides = array<i32>} : memref<60x128xf32, #tpu.memory_space<vmem>>, vector<6x128xf32>,
    %c0_135 = arith.constant 0 : index
    %c0_136 = arith.constant 0 : index
    %185 = vector.load %arg35[%c0_135, %c0_136] : memref<60x128xf32, #tpu.memory_space<vmem>>, vector<30x128xf32>
    %c0_137 = arith.constant 0 : index
    %c0_138 = arith.constant 0 : index
    %186 = vector.load %arg10[%c0_137, %c0_138] : memref<6x30xf32, #tpu.memory_space<vmem>>, vector<6x30xf32>
    %cst_139 = arith.constant dense<0.000000e+00> : vector<6x128xf32>
    %187 = tpu.matmul %186, %185, %cst_139 {dimension_numbers = #tpu.dot_dimension_numbers<[1], [0], [0], [1], [0, 0, 1, 1], [], []>} : vector<6x30xf32>, vector<30x128xf32>, vector<6x128xf32> -> vector<6x128xf32>
    %cst_140 = arith.constant dense<0.000000e+00> : vector<6xf32>
    %188 = vector.multi_reduction <add>, %187, %cst_140 [1] : vector<6x128xf32> to vector<6xf32>
    %189 = vector.shape_cast %188 : vector<6xf32> to vector<6x1xf32>
    %cst_141 = arith.constant 3.125000e-02 : f32
    %190 = vector.broadcast %cst_141 : f32 to vector<6x1xf32>
    %191 = arith.mulf %189, %190 : vector<6x1xf32>
    %192 = arith.mulf %187, %187 : vector<6x128xf32>
    %cst_142 = arith.constant dense<0.000000e+00> : vector<6xf32>
    %193 = vector.multi_reduction <add>, %192, %cst_142 [1] : vector<6x128xf32> to vector<6xf32>
    %194 = vector.shape_cast %193 : vector<6xf32> to vector<6x1xf32>
    %cst_143 = arith.constant 3.125000e-02 : f32
    %195 = vector.broadcast %cst_143 : f32 to vector<6x1xf32>
    %196 = arith.mulf %194, %195 : vector<6x1xf32>
    %197 = arith.mulf %191, %191 : vector<6x1xf32>
    %198 = arith.subf %196, %197 : vector<6x1xf32>
    %c0_144 = arith.constant 0 : index
    %c0_145 = arith.constant 0 : index
    %199 = vector.load %arg11[%c0_144, %c0_145] : memref<6x1xf32, #tpu.memory_space<vmem>>, vector<6x1xf32>
    %cst_146 = arith.constant 9.99999974E-6 : f32
    %200 = vector.broadcast %cst_146 : f32 to vector<6x1xf32>
    %201 = arith.addf %198, %200 : vector<6x1xf32>
    %202 = math.rsqrt %201 : vector<6x1xf32>
    %203 = arith.mulf %199, %202 : vector<6x1xf32>
    %c0_147 = arith.constant 0 : index
    %c0_148 = arith.constant 0 : index
    %204 = vector.load %arg12[%c0_147, %c0_148] : memref<6x1xf32, #tpu.memory_space<vmem>>, vector<6x1xf32>
    %205 = arith.mulf %191, %203 : vector<6x1xf32>
    %206 = arith.subf %204, %205 : vector<6x1xf32>
    %207 = vector.broadcast %203 : vector<6x1xf32> to vector<6x128xf32>
    %208 = arith.mulf %187, %207 : vector<6x128xf32>
    %209 = vector.broadcast %206 : vector<6x1xf32> to vector<6x128xf32>
    %210 = arith.addf %208, %209 : vector<6x128xf32>
    %c0_149 = arith.constant 0 : index
    %c0_150 = arith.constant 0 : index
    %211 = vector.load %arg27[%c0_149, %c0_150] : memref<5x128xf32, #tpu.memory_space<vmem>>, vector<1x128xf32>
    %c2_i32_151 = arith.constant 2 : i32
    %212 = tpu.dynamic_rotate %210 by %c2_i32_151 dim 1 : vector<6x128xf32>, i32 -> vector<6x128xf32>
    %213 = vector.broadcast %211 : vector<1x128xf32> to vector<6x128xf32>
    %214 = arith.mulf %212, %213 : vector<6x128xf32>
    %c0_152 = arith.constant 0 : index
    %c0_153 = arith.constant 0 : index
    %215 = vector.load %arg35[%c0_152, %c0_153] : memref<60x128xf32, #tpu.memory_space<vmem>>, vector<6x128xf32>
    tpu.vector_store %arg35[%c0_152, %c0_153], %214 {strides = array<i32>} : memref<60x128xf32, #tpu.memory_space<vmem>>, vector<6x128xf32>,
    %c1_154 = arith.constant 1 : index
    %c0_155 = arith.constant 0 : index
    %216 = vector.load %arg27[%c1_154, %c0_155] : memref<5x128xf32, #tpu.memory_space<vmem>>, vector<1x128xf32>
    %c1_i32_156 = arith.constant 1 : i32
    %217 = tpu.dynamic_rotate %210 by %c1_i32_156 dim 1 : vector<6x128xf32>, i32 -> vector<6x128xf32>
    %218 = vector.broadcast %216 : vector<1x128xf32> to vector<6x128xf32>
    %219 = arith.mulf %217, %218 : vector<6x128xf32>
    %c6_157 = arith.constant 6 : index
    %c0_158 = arith.constant 0 : index
    %220 = vector.load %arg35[%c6_157, %c0_158] : memref<60x128xf32, #tpu.memory_space<vmem>>, vector<6x128xf32>
    tpu.vector_store %arg35[%c6_157, %c0_158], %219 {strides = array<i32>} : memref<60x128xf32, #tpu.memory_space<vmem>>, vector<6x128xf32>,
    %c2_159 = arith.constant 2 : index
    %c0_160 = arith.constant 0 : index
    %221 = vector.load %arg27[%c2_159, %c0_160] : memref<5x128xf32, #tpu.memory_space<vmem>>, vector<1x128xf32>
    %222 = vector.broadcast %221 : vector<1x128xf32> to vector<6x128xf32>
    %223 = arith.mulf %210, %222 : vector<6x128xf32>
    %c12_161 = arith.constant 12 : index
    %c0_162 = arith.constant 0 : index
    %224 = vector.load %arg35[%c12_161, %c0_162] : memref<60x128xf32, #tpu.memory_space<vmem>>, vector<6x128xf32>
    tpu.vector_store %arg35[%c12_161, %c0_162], %223 {strides = array<i32>} : memref<60x128xf32, #tpu.memory_space<vmem>>, vector<6x128xf32>,
    %c3_163 = arith.constant 3 : index
    %c0_164 = arith.constant 0 : index
    %225 = vector.load %arg27[%c3_163, %c0_164] : memref<5x128xf32, #tpu.memory_space<vmem>>, vector<1x128xf32>
    %c127_i32_165 = arith.constant 127 : i32
    %226 = tpu.dynamic_rotate %210 by %c127_i32_165 dim 1 : vector<6x128xf32>, i32 -> vector<6x128xf32>
    %227 = vector.broadcast %225 : vector<1x128xf32> to vector<6x128xf32>
    %228 = arith.mulf %226, %227 : vector<6x128xf32>
    %c18_166 = arith.constant 18 : index
    %c0_167 = arith.constant 0 : index
    %229 = vector.load %arg35[%c18_166, %c0_167] : memref<60x128xf32, #tpu.memory_space<vmem>>, vector<6x128xf32>
    tpu.vector_store %arg35[%c18_166, %c0_167], %228 {strides = array<i32>} : memref<60x128xf32, #tpu.memory_space<vmem>>, vector<6x128xf32>,
    %c4_168 = arith.constant 4 : index
    %c0_169 = arith.constant 0 : index
    %230 = vector.load %arg27[%c4_168, %c0_169] : memref<5x128xf32, #tpu.memory_space<vmem>>, vector<1x128xf32>
    %c126_i32_170 = arith.constant 126 : i32
    %231 = tpu.dynamic_rotate %210 by %c126_i32_170 dim 1 : vector<6x128xf32>, i32 -> vector<6x128xf32>
    %232 = vector.broadcast %230 : vector<1x128xf32> to vector<6x128xf32>
    %233 = arith.mulf %231, %232 : vector<6x128xf32>
    %c24_171 = arith.constant 24 : index
    %c0_172 = arith.constant 0 : index
    %234 = vector.load %arg35[%c24_171, %c0_172] : memref<60x128xf32, #tpu.memory_space<vmem>>, vector<6x128xf32>
    tpu.vector_store %arg35[%c24_171, %c0_172], %233 {strides = array<i32>} : memref<60x128xf32, #tpu.memory_space<vmem>>, vector<6x128xf32>,
    %c0_173 = arith.constant 0 : index
    %c0_174 = arith.constant 0 : index
    %235 = vector.load %arg35[%c0_173, %c0_174] : memref<60x128xf32, #tpu.memory_space<vmem>>, vector<30x128xf32>
    %c0_175 = arith.constant 0 : index
    %c0_176 = arith.constant 0 : index
    %236 = vector.load %arg13[%c0_175, %c0_176] : memref<6x30xf32, #tpu.memory_space<vmem>>, vector<6x30xf32>
    %cst_177 = arith.constant dense<0.000000e+00> : vector<6x128xf32>
    %237 = tpu.matmul %236, %235, %cst_177 {dimension_numbers = #tpu.dot_dimension_numbers<[1], [0], [0], [1], [0, 0, 1, 1], [], []>} : vector<6x30xf32>, vector<30x128xf32>, vector<6x128xf32> -> vector<6x128xf32>
    %cst_178 = arith.constant dense<0.000000e+00> : vector<6xf32>
    %238 = vector.multi_reduction <add>, %237, %cst_178 [1] : vector<6x128xf32> to vector<6xf32>
    %239 = vector.shape_cast %238 : vector<6xf32> to vector<6x1xf32>
    %cst_179 = arith.constant 3.125000e-02 : f32
    %240 = vector.broadcast %cst_179 : f32 to vector<6x1xf32>
    %241 = arith.mulf %239, %240 : vector<6x1xf32>
    %242 = arith.mulf %237, %237 : vector<6x128xf32>
    %cst_180 = arith.constant dense<0.000000e+00> : vector<6xf32>
    %243 = vector.multi_reduction <add>, %242, %cst_180 [1] : vector<6x128xf32> to vector<6xf32>
    %244 = vector.shape_cast %243 : vector<6xf32> to vector<6x1xf32>
    %cst_181 = arith.constant 3.125000e-02 : f32
    %245 = vector.broadcast %cst_181 : f32 to vector<6x1xf32>
    %246 = arith.mulf %244, %245 : vector<6x1xf32>
    %247 = arith.mulf %241, %241 : vector<6x1xf32>
    %248 = arith.subf %246, %247 : vector<6x1xf32>
    %c0_182 = arith.constant 0 : index
    %c0_183 = arith.constant 0 : index
    %249 = vector.load %arg14[%c0_182, %c0_183] : memref<6x1xf32, #tpu.memory_space<vmem>>, vector<6x1xf32>
    %cst_184 = arith.constant 9.99999974E-6 : f32
    %250 = vector.broadcast %cst_184 : f32 to vector<6x1xf32>
    %251 = arith.addf %248, %250 : vector<6x1xf32>
    %252 = math.rsqrt %251 : vector<6x1xf32>
    %253 = arith.mulf %249, %252 : vector<6x1xf32>
    %c0_185 = arith.constant 0 : index
    %c0_186 = arith.constant 0 : index
    %254 = vector.load %arg15[%c0_185, %c0_186] : memref<6x1xf32, #tpu.memory_space<vmem>>, vector<6x1xf32>
    %255 = arith.mulf %241, %253 : vector<6x1xf32>
    %256 = arith.subf %254, %255 : vector<6x1xf32>
    %257 = vector.broadcast %253 : vector<6x1xf32> to vector<6x128xf32>
    %258 = arith.mulf %237, %257 : vector<6x128xf32>
    %259 = vector.broadcast %256 : vector<6x1xf32> to vector<6x128xf32>
    %260 = arith.addf %258, %259 : vector<6x128xf32>
    %c0_187 = arith.constant 0 : index
    %c0_188 = arith.constant 0 : index
    %261 = vector.load %arg27[%c0_187, %c0_188] : memref<5x128xf32, #tpu.memory_space<vmem>>, vector<1x128xf32>
    %c2_i32_189 = arith.constant 2 : i32
    %262 = tpu.dynamic_rotate %260 by %c2_i32_189 dim 1 : vector<6x128xf32>, i32 -> vector<6x128xf32>
    %263 = vector.broadcast %261 : vector<1x128xf32> to vector<6x128xf32>
    %264 = arith.mulf %262, %263 : vector<6x128xf32>
    %c0_190 = arith.constant 0 : index
    %c0_191 = arith.constant 0 : index
    %265 = vector.load %arg35[%c0_190, %c0_191] : memref<60x128xf32, #tpu.memory_space<vmem>>, vector<6x128xf32>
    tpu.vector_store %arg35[%c0_190, %c0_191], %264 {strides = array<i32>} : memref<60x128xf32, #tpu.memory_space<vmem>>, vector<6x128xf32>,
    %c2_i32_192 = arith.constant 2 : i32
    %266 = tpu.dynamic_rotate %210 by %c2_i32_192 dim 1 : vector<6x128xf32>, i32 -> vector<6x128xf32>
    %267 = vector.broadcast %261 : vector<1x128xf32> to vector<6x128xf32>
    %268 = arith.mulf %266, %267 : vector<6x128xf32>
    %c6_193 = arith.constant 6 : index
    %c0_194 = arith.constant 0 : index
    %269 = vector.load %arg35[%c6_193, %c0_194] : memref<60x128xf32, #tpu.memory_space<vmem>>, vector<6x128xf32>
    tpu.vector_store %arg35[%c6_193, %c0_194], %268 {strides = array<i32>} : memref<60x128xf32, #tpu.memory_space<vmem>>, vector<6x128xf32>,
    %c1_195 = arith.constant 1 : index
    %c0_196 = arith.constant 0 : index
    %270 = vector.load %arg27[%c1_195, %c0_196] : memref<5x128xf32, #tpu.memory_space<vmem>>, vector<1x128xf32>
    %c1_i32_197 = arith.constant 1 : i32
    %271 = tpu.dynamic_rotate %260 by %c1_i32_197 dim 1 : vector<6x128xf32>, i32 -> vector<6x128xf32>
    %272 = vector.broadcast %270 : vector<1x128xf32> to vector<6x128xf32>
    %273 = arith.mulf %271, %272 : vector<6x128xf32>
    %c12_198 = arith.constant 12 : index
    %c0_199 = arith.constant 0 : index
    %274 = vector.load %arg35[%c12_198, %c0_199] : memref<60x128xf32, #tpu.memory_space<vmem>>, vector<6x128xf32>
    tpu.vector_store %arg35[%c12_198, %c0_199], %273 {strides = array<i32>} : memref<60x128xf32, #tpu.memory_space<vmem>>, vector<6x128xf32>,
    %c1_i32_200 = arith.constant 1 : i32
    %275 = tpu.dynamic_rotate %210 by %c1_i32_200 dim 1 : vector<6x128xf32>, i32 -> vector<6x128xf32>
    %276 = vector.broadcast %270 : vector<1x128xf32> to vector<6x128xf32>
    %277 = arith.mulf %275, %276 : vector<6x128xf32>
    %c18_201 = arith.constant 18 : index
    %c0_202 = arith.constant 0 : index
    %278 = vector.load %arg35[%c18_201, %c0_202] : memref<60x128xf32, #tpu.memory_space<vmem>>, vector<6x128xf32>
    tpu.vector_store %arg35[%c18_201, %c0_202], %277 {strides = array<i32>} : memref<60x128xf32, #tpu.memory_space<vmem>>, vector<6x128xf32>,
    %c2_203 = arith.constant 2 : index
    %c0_204 = arith.constant 0 : index
    %279 = vector.load %arg27[%c2_203, %c0_204] : memref<5x128xf32, #tpu.memory_space<vmem>>, vector<1x128xf32>
    %280 = vector.broadcast %279 : vector<1x128xf32> to vector<6x128xf32>
    %281 = arith.mulf %260, %280 : vector<6x128xf32>
    %c24_205 = arith.constant 24 : index
    %c0_206 = arith.constant 0 : index
    %282 = vector.load %arg35[%c24_205, %c0_206] : memref<60x128xf32, #tpu.memory_space<vmem>>, vector<6x128xf32>
    tpu.vector_store %arg35[%c24_205, %c0_206], %281 {strides = array<i32>} : memref<60x128xf32, #tpu.memory_space<vmem>>, vector<6x128xf32>,
    %283 = vector.broadcast %279 : vector<1x128xf32> to vector<6x128xf32>
    %284 = arith.mulf %210, %283 : vector<6x128xf32>
    %c30 = arith.constant 30 : index
    %c0_207 = arith.constant 0 : index
    %285 = vector.load %arg35[%c30, %c0_207] : memref<60x128xf32, #tpu.memory_space<vmem>>, vector<6x128xf32>
    tpu.vector_store %arg35[%c30, %c0_207], %284 {strides = array<i32>} : memref<60x128xf32, #tpu.memory_space<vmem>>, vector<6x128xf32>,
    %c3_208 = arith.constant 3 : index
    %c0_209 = arith.constant 0 : index
    %286 = vector.load %arg27[%c3_208, %c0_209] : memref<5x128xf32, #tpu.memory_space<vmem>>, vector<1x128xf32>
    %c127_i32_210 = arith.constant 127 : i32
    %287 = tpu.dynamic_rotate %260 by %c127_i32_210 dim 1 : vector<6x128xf32>, i32 -> vector<6x128xf32>
    %288 = vector.broadcast %286 : vector<1x128xf32> to vector<6x128xf32>
    %289 = arith.mulf %287, %288 : vector<6x128xf32>
    %c36 = arith.constant 36 : index
    %c0_211 = arith.constant 0 : index
    %290 = vector.load %arg35[%c36, %c0_211] : memref<60x128xf32, #tpu.memory_space<vmem>>, vector<6x128xf32>
    tpu.vector_store %arg35[%c36, %c0_211], %289 {strides = array<i32>} : memref<60x128xf32, #tpu.memory_space<vmem>>, vector<6x128xf32>,
    %c127_i32_212 = arith.constant 127 : i32
    %291 = tpu.dynamic_rotate %210 by %c127_i32_212 dim 1 : vector<6x128xf32>, i32 -> vector<6x128xf32>
    %292 = vector.broadcast %286 : vector<1x128xf32> to vector<6x128xf32>
    %293 = arith.mulf %291, %292 : vector<6x128xf32>
    %c42 = arith.constant 42 : index
    %c0_213 = arith.constant 0 : index
    %294 = vector.load %arg35[%c42, %c0_213] : memref<60x128xf32, #tpu.memory_space<vmem>>, vector<6x128xf32>
    tpu.vector_store %arg35[%c42, %c0_213], %293 {strides = array<i32>} : memref<60x128xf32, #tpu.memory_space<vmem>>, vector<6x128xf32>,
    %c4_214 = arith.constant 4 : index
    %c0_215 = arith.constant 0 : index
    %295 = vector.load %arg27[%c4_214, %c0_215] : memref<5x128xf32, #tpu.memory_space<vmem>>, vector<1x128xf32>
    %c126_i32_216 = arith.constant 126 : i32
    %296 = tpu.dynamic_rotate %260 by %c126_i32_216 dim 1 : vector<6x128xf32>, i32 -> vector<6x128xf32>
    %297 = vector.broadcast %295 : vector<1x128xf32> to vector<6x128xf32>
    %298 = arith.mulf %296, %297 : vector<6x128xf32>
    %c48 = arith.constant 48 : index
    %c0_217 = arith.constant 0 : index
    %299 = vector.load %arg35[%c48, %c0_217] : memref<60x128xf32, #tpu.memory_space<vmem>>, vector<6x128xf32>
    tpu.vector_store %arg35[%c48, %c0_217], %298 {strides = array<i32>} : memref<60x128xf32, #tpu.memory_space<vmem>>, vector<6x128xf32>,
    %c126_i32_218 = arith.constant 126 : i32
    %300 = tpu.dynamic_rotate %210 by %c126_i32_218 dim 1 : vector<6x128xf32>, i32 -> vector<6x128xf32>
    %301 = vector.broadcast %295 : vector<1x128xf32> to vector<6x128xf32>
    %302 = arith.mulf %300, %301 : vector<6x128xf32>
    %c54 = arith.constant 54 : index
    %c0_219 = arith.constant 0 : index
    %303 = vector.load %arg35[%c54, %c0_219] : memref<60x128xf32, #tpu.memory_space<vmem>>, vector<6x128xf32>
    tpu.vector_store %arg35[%c54, %c0_219], %302 {strides = array<i32>} : memref<60x128xf32, #tpu.memory_space<vmem>>, vector<6x128xf32>,
    %c0_220 = arith.constant 0 : index
    %c0_221 = arith.constant 0 : index
    %304 = vector.load %arg35[%c0_220, %c0_221] : memref<60x128xf32, #tpu.memory_space<vmem>>, vector<60x128xf32>
    %c0_222 = arith.constant 0 : index
    %c0_223 = arith.constant 0 : index
    %305 = vector.load %arg22[%c0_222, %c0_223] : memref<6x60xf32, #tpu.memory_space<vmem>>, vector<6x60xf32>
    %cst_224 = arith.constant dense<0.000000e+00> : vector<6x128xf32>
    %306 = tpu.matmul %305, %304, %cst_224 {dimension_numbers = #tpu.dot_dimension_numbers<[1], [0], [0], [1], [0, 0, 1, 1], [], []>} : vector<6x60xf32>, vector<60x128xf32>, vector<6x128xf32> -> vector<6x128xf32>
    %cst_225 = arith.constant dense<0.000000e+00> : vector<6xf32>
    %307 = vector.multi_reduction <add>, %306, %cst_225 [1] : vector<6x128xf32> to vector<6xf32>
    %308 = vector.shape_cast %307 : vector<6xf32> to vector<6x1xf32>
    %cst_226 = arith.constant 3.125000e-02 : f32
    %309 = vector.broadcast %cst_226 : f32 to vector<6x1xf32>
    %310 = arith.mulf %308, %309 : vector<6x1xf32>
    %311 = arith.mulf %306, %306 : vector<6x128xf32>
    %cst_227 = arith.constant dense<0.000000e+00> : vector<6xf32>
    %312 = vector.multi_reduction <add>, %311, %cst_227 [1] : vector<6x128xf32> to vector<6xf32>
    %313 = vector.shape_cast %312 : vector<6xf32> to vector<6x1xf32>
    %cst_228 = arith.constant 3.125000e-02 : f32
    %314 = vector.broadcast %cst_228 : f32 to vector<6x1xf32>
    %315 = arith.mulf %313, %314 : vector<6x1xf32>
    %316 = arith.mulf %310, %310 : vector<6x1xf32>
    %317 = arith.subf %315, %316 : vector<6x1xf32>
    %c0_229 = arith.constant 0 : index
    %c0_230 = arith.constant 0 : index
    %318 = vector.load %arg23[%c0_229, %c0_230] : memref<6x1xf32, #tpu.memory_space<vmem>>, vector<6x1xf32>
    %cst_231 = arith.constant 9.99999974E-6 : f32
    %319 = vector.broadcast %cst_231 : f32 to vector<6x1xf32>
    %320 = arith.addf %317, %319 : vector<6x1xf32>
    %321 = math.rsqrt %320 : vector<6x1xf32>
    %322 = arith.mulf %318, %321 : vector<6x1xf32>
    %c0_232 = arith.constant 0 : index
    %c0_233 = arith.constant 0 : index
    %323 = vector.load %arg24[%c0_232, %c0_233] : memref<6x1xf32, #tpu.memory_space<vmem>>, vector<6x1xf32>
    %324 = arith.mulf %310, %322 : vector<6x1xf32>
    %325 = arith.subf %323, %324 : vector<6x1xf32>
    %326 = vector.broadcast %322 : vector<6x1xf32> to vector<6x128xf32>
    %327 = arith.mulf %306, %326 : vector<6x128xf32>
    %328 = vector.broadcast %325 : vector<6x1xf32> to vector<6x128xf32>
    %329 = arith.addf %327, %328 : vector<6x128xf32>
    %c0_234 = arith.constant 0 : index
    %c0_235 = arith.constant 0 : index
    %330 = vector.load %arg32[%c0_234, %c0_235] : memref<128x128xf32, #tpu.memory_space<vmem>>, vector<128x128xf32>
    %cst_236 = arith.constant dense<0.000000e+00> : vector<6x128xf32>
    %331 = tpu.matmul %329, %330, %cst_236 {dimension_numbers = #tpu.dot_dimension_numbers<[1], [0], [0], [1], [0, 0, 1, 1], [], []>} : vector<6x128xf32>, vector<128x128xf32>, vector<6x128xf32> -> vector<6x128xf32>
    %c0_237 = arith.constant 0 : index
    %c0_238 = arith.constant 0 : index
    %332 = vector.load %arg26[%c0_237, %c0_238] : memref<5x128xf32, #tpu.memory_space<vmem>>, vector<1x128xf32>
    %c2_i32_239 = arith.constant 2 : i32
    %333 = tpu.dynamic_rotate %331 by %c2_i32_239 dim 1 : vector<6x128xf32>, i32 -> vector<6x128xf32>
    %334 = vector.broadcast %332 : vector<1x128xf32> to vector<6x128xf32>
    %335 = arith.mulf %333, %334 : vector<6x128xf32>
    %c0_240 = arith.constant 0 : index
    %c0_241 = arith.constant 0 : index
    %336 = vector.load %arg35[%c0_240, %c0_241] : memref<60x128xf32, #tpu.memory_space<vmem>>, vector<6x128xf32>
    tpu.vector_store %arg35[%c0_240, %c0_241], %335 {strides = array<i32>} : memref<60x128xf32, #tpu.memory_space<vmem>>, vector<6x128xf32>,
    %c2_i32_242 = arith.constant 2 : i32
    %337 = tpu.dynamic_rotate %155 by %c2_i32_242 dim 1 : vector<6x128xf32>, i32 -> vector<6x128xf32>
    %338 = vector.broadcast %332 : vector<1x128xf32> to vector<6x128xf32>
    %339 = arith.mulf %337, %338 : vector<6x128xf32>
    %c6_243 = arith.constant 6 : index
    %c0_244 = arith.constant 0 : index
    %340 = vector.load %arg35[%c6_243, %c0_244] : memref<60x128xf32, #tpu.memory_space<vmem>>, vector<6x128xf32>
    tpu.vector_store %arg35[%c6_243, %c0_244], %339 {strides = array<i32>} : memref<60x128xf32, #tpu.memory_space<vmem>>, vector<6x128xf32>,
    %c1_245 = arith.constant 1 : index
    %c0_246 = arith.constant 0 : index
    %341 = vector.load %arg26[%c1_245, %c0_246] : memref<5x128xf32, #tpu.memory_space<vmem>>, vector<1x128xf32>
    %c1_i32_247 = arith.constant 1 : i32
    %342 = tpu.dynamic_rotate %331 by %c1_i32_247 dim 1 : vector<6x128xf32>, i32 -> vector<6x128xf32>
    %343 = vector.broadcast %341 : vector<1x128xf32> to vector<6x128xf32>
    %344 = arith.mulf %342, %343 : vector<6x128xf32>
    %c12_248 = arith.constant 12 : index
    %c0_249 = arith.constant 0 : index
    %345 = vector.load %arg35[%c12_248, %c0_249] : memref<60x128xf32, #tpu.memory_space<vmem>>, vector<6x128xf32>
    tpu.vector_store %arg35[%c12_248, %c0_249], %344 {strides = array<i32>} : memref<60x128xf32, #tpu.memory_space<vmem>>, vector<6x128xf32>,
    %c1_i32_250 = arith.constant 1 : i32
    %346 = tpu.dynamic_rotate %155 by %c1_i32_250 dim 1 : vector<6x128xf32>, i32 -> vector<6x128xf32>
    %347 = vector.broadcast %341 : vector<1x128xf32> to vector<6x128xf32>
    %348 = arith.mulf %346, %347 : vector<6x128xf32>
    %c18_251 = arith.constant 18 : index
    %c0_252 = arith.constant 0 : index
    %349 = vector.load %arg35[%c18_251, %c0_252] : memref<60x128xf32, #tpu.memory_space<vmem>>, vector<6x128xf32>
    tpu.vector_store %arg35[%c18_251, %c0_252], %348 {strides = array<i32>} : memref<60x128xf32, #tpu.memory_space<vmem>>, vector<6x128xf32>,
    %c2_253 = arith.constant 2 : index
    %c0_254 = arith.constant 0 : index
    %350 = vector.load %arg26[%c2_253, %c0_254] : memref<5x128xf32, #tpu.memory_space<vmem>>, vector<1x128xf32>
    %351 = vector.broadcast %350 : vector<1x128xf32> to vector<6x128xf32>
    %352 = arith.mulf %331, %351 : vector<6x128xf32>
    %c24_255 = arith.constant 24 : index
    %c0_256 = arith.constant 0 : index
    %353 = vector.load %arg35[%c24_255, %c0_256] : memref<60x128xf32, #tpu.memory_space<vmem>>, vector<6x128xf32>
    tpu.vector_store %arg35[%c24_255, %c0_256], %352 {strides = array<i32>} : memref<60x128xf32, #tpu.memory_space<vmem>>, vector<6x128xf32>,
    %354 = vector.broadcast %350 : vector<1x128xf32> to vector<6x128xf32>
    %355 = arith.mulf %155, %354 : vector<6x128xf32>
    %c30_257 = arith.constant 30 : index
    %c0_258 = arith.constant 0 : index
    %356 = vector.load %arg35[%c30_257, %c0_258] : memref<60x128xf32, #tpu.memory_space<vmem>>, vector<6x128xf32>
    tpu.vector_store %arg35[%c30_257, %c0_258], %355 {strides = array<i32>} : memref<60x128xf32, #tpu.memory_space<vmem>>, vector<6x128xf32>,
    %c3_259 = arith.constant 3 : index
    %c0_260 = arith.constant 0 : index
    %357 = vector.load %arg26[%c3_259, %c0_260] : memref<5x128xf32, #tpu.memory_space<vmem>>, vector<1x128xf32>
    %c127_i32_261 = arith.constant 127 : i32
    %358 = tpu.dynamic_rotate %331 by %c127_i32_261 dim 1 : vector<6x128xf32>, i32 -> vector<6x128xf32>
    %359 = vector.broadcast %357 : vector<1x128xf32> to vector<6x128xf32>
    %360 = arith.mulf %358, %359 : vector<6x128xf32>
    %c36_262 = arith.constant 36 : index
    %c0_263 = arith.constant 0 : index
    %361 = vector.load %arg35[%c36_262, %c0_263] : memref<60x128xf32, #tpu.memory_space<vmem>>, vector<6x128xf32>
    tpu.vector_store %arg35[%c36_262, %c0_263], %360 {strides = array<i32>} : memref<60x128xf32, #tpu.memory_space<vmem>>, vector<6x128xf32>,
    %c127_i32_264 = arith.constant 127 : i32
    %362 = tpu.dynamic_rotate %155 by %c127_i32_264 dim 1 : vector<6x128xf32>, i32 -> vector<6x128xf32>
    %363 = vector.broadcast %357 : vector<1x128xf32> to vector<6x128xf32>
    %364 = arith.mulf %362, %363 : vector<6x128xf32>
    %c42_265 = arith.constant 42 : index
    %c0_266 = arith.constant 0 : index
    %365 = vector.load %arg35[%c42_265, %c0_266] : memref<60x128xf32, #tpu.memory_space<vmem>>, vector<6x128xf32>
    tpu.vector_store %arg35[%c42_265, %c0_266], %364 {strides = array<i32>} : memref<60x128xf32, #tpu.memory_space<vmem>>, vector<6x128xf32>,
    %c4_267 = arith.constant 4 : index
    %c0_268 = arith.constant 0 : index
    %366 = vector.load %arg26[%c4_267, %c0_268] : memref<5x128xf32, #tpu.memory_space<vmem>>, vector<1x128xf32>
    %c126_i32_269 = arith.constant 126 : i32
    %367 = tpu.dynamic_rotate %331 by %c126_i32_269 dim 1 : vector<6x128xf32>, i32 -> vector<6x128xf32>
    %368 = vector.broadcast %366 : vector<1x128xf32> to vector<6x128xf32>
    %369 = arith.mulf %367, %368 : vector<6x128xf32>
    %c48_270 = arith.constant 48 : index
    %c0_271 = arith.constant 0 : index
    %370 = vector.load %arg35[%c48_270, %c0_271] : memref<60x128xf32, #tpu.memory_space<vmem>>, vector<6x128xf32>
    tpu.vector_store %arg35[%c48_270, %c0_271], %369 {strides = array<i32>} : memref<60x128xf32, #tpu.memory_space<vmem>>, vector<6x128xf32>,
    %c126_i32_272 = arith.constant 126 : i32
    %371 = tpu.dynamic_rotate %155 by %c126_i32_272 dim 1 : vector<6x128xf32>, i32 -> vector<6x128xf32>
    %372 = vector.broadcast %366 : vector<1x128xf32> to vector<6x128xf32>
    %373 = arith.mulf %371, %372 : vector<6x128xf32>
    %c54_273 = arith.constant 54 : index
    %c0_274 = arith.constant 0 : index
    %374 = vector.load %arg35[%c54_273, %c0_274] : memref<60x128xf32, #tpu.memory_space<vmem>>, vector<6x128xf32>
    tpu.vector_store %arg35[%c54_273, %c0_274], %373 {strides = array<i32>} : memref<60x128xf32, #tpu.memory_space<vmem>>, vector<6x128xf32>,
    %c0_275 = arith.constant 0 : index
    %c0_276 = arith.constant 0 : index
    %375 = vector.load %arg35[%c0_275, %c0_276] : memref<60x128xf32, #tpu.memory_space<vmem>>, vector<60x128xf32>
    %c0_277 = arith.constant 0 : index
    %c0_278 = arith.constant 0 : index
    %376 = vector.load %arg19[%c0_277, %c0_278] : memref<6x60xf32, #tpu.memory_space<vmem>>, vector<6x60xf32>
    %cst_279 = arith.constant dense<0.000000e+00> : vector<6x128xf32>
    %377 = tpu.matmul %376, %375, %cst_279 {dimension_numbers = #tpu.dot_dimension_numbers<[1], [0], [0], [1], [0, 0, 1, 1], [], []>} : vector<6x60xf32>, vector<60x128xf32>, vector<6x128xf32> -> vector<6x128xf32>
    %cst_280 = arith.constant dense<0.000000e+00> : vector<6xf32>
    %378 = vector.multi_reduction <add>, %377, %cst_280 [1] : vector<6x128xf32> to vector<6xf32>
    %379 = vector.shape_cast %378 : vector<6xf32> to vector<6x1xf32>
    %cst_281 = arith.constant 1.562500e-02 : f32
    %380 = vector.broadcast %cst_281 : f32 to vector<6x1xf32>
    %381 = arith.mulf %379, %380 : vector<6x1xf32>
    %382 = arith.mulf %377, %377 : vector<6x128xf32>
    %cst_282 = arith.constant dense<0.000000e+00> : vector<6xf32>
    %383 = vector.multi_reduction <add>, %382, %cst_282 [1] : vector<6x128xf32> to vector<6xf32>
    %384 = vector.shape_cast %383 : vector<6xf32> to vector<6x1xf32>
    %cst_283 = arith.constant 1.562500e-02 : f32
    %385 = vector.broadcast %cst_283 : f32 to vector<6x1xf32>
    %386 = arith.mulf %384, %385 : vector<6x1xf32>
    %387 = arith.mulf %381, %381 : vector<6x1xf32>
    %388 = arith.subf %386, %387 : vector<6x1xf32>
    %c0_284 = arith.constant 0 : index
    %c0_285 = arith.constant 0 : index
    %389 = vector.load %arg20[%c0_284, %c0_285] : memref<6x1xf32, #tpu.memory_space<vmem>>, vector<6x1xf32>
    %cst_286 = arith.constant 9.99999974E-6 : f32
    %390 = vector.broadcast %cst_286 : f32 to vector<6x1xf32>
    %391 = arith.addf %388, %390 : vector<6x1xf32>
    %392 = math.rsqrt %391 : vector<6x1xf32>
    %393 = arith.mulf %389, %392 : vector<6x1xf32>
    %c0_287 = arith.constant 0 : index
    %c0_288 = arith.constant 0 : index
    %394 = vector.load %arg21[%c0_287, %c0_288] : memref<6x1xf32, #tpu.memory_space<vmem>>, vector<6x1xf32>
    %395 = arith.mulf %381, %393 : vector<6x1xf32>
    %396 = arith.subf %394, %395 : vector<6x1xf32>
    %397 = vector.broadcast %393 : vector<6x1xf32> to vector<6x128xf32>
    %398 = arith.mulf %377, %397 : vector<6x128xf32>
    %399 = vector.broadcast %396 : vector<6x1xf32> to vector<6x128xf32>
    %400 = arith.addf %398, %399 : vector<6x128xf32>
    %c0_289 = arith.constant 0 : index
    %c0_290 = arith.constant 0 : index
    %401 = vector.load %arg33[%c0_289, %c0_290] : memref<128x128xf32, #tpu.memory_space<vmem>>, vector<128x128xf32>
    %cst_291 = arith.constant dense<0.000000e+00> : vector<6x128xf32>
    %402 = tpu.matmul %400, %401, %cst_291 {dimension_numbers = #tpu.dot_dimension_numbers<[1], [0], [0], [1], [0, 0, 1, 1], [], []>} : vector<6x128xf32>, vector<128x128xf32>, vector<6x128xf32> -> vector<6x128xf32>
    %c0_292 = arith.constant 0 : index
    %c0_293 = arith.constant 0 : index
    %403 = vector.load %arg25[%c0_292, %c0_293] : memref<5x128xf32, #tpu.memory_space<vmem>>, vector<1x128xf32>
    %c2_i32_294 = arith.constant 2 : i32
    %404 = tpu.dynamic_rotate %402 by %c2_i32_294 dim 1 : vector<6x128xf32>, i32 -> vector<6x128xf32>
    %405 = vector.broadcast %403 : vector<1x128xf32> to vector<6x128xf32>
    %406 = arith.mulf %404, %405 : vector<6x128xf32>
    %c0_295 = arith.constant 0 : index
    %c0_296 = arith.constant 0 : index
    %407 = vector.load %arg35[%c0_295, %c0_296] : memref<60x128xf32, #tpu.memory_space<vmem>>, vector<6x128xf32>
    tpu.vector_store %arg35[%c0_295, %c0_296], %406 {strides = array<i32>} : memref<60x128xf32, #tpu.memory_space<vmem>>, vector<6x128xf32>,
    %c2_i32_297 = arith.constant 2 : i32
    %408 = tpu.dynamic_rotate %100 by %c2_i32_297 dim 1 : vector<6x128xf32>, i32 -> vector<6x128xf32>
    %409 = vector.broadcast %403 : vector<1x128xf32> to vector<6x128xf32>
    %410 = arith.mulf %408, %409 : vector<6x128xf32>
    %c6_298 = arith.constant 6 : index
    %c0_299 = arith.constant 0 : index
    %411 = vector.load %arg35[%c6_298, %c0_299] : memref<60x128xf32, #tpu.memory_space<vmem>>, vector<6x128xf32>
    tpu.vector_store %arg35[%c6_298, %c0_299], %410 {strides = array<i32>} : memref<60x128xf32, #tpu.memory_space<vmem>>, vector<6x128xf32>,
    %c1_300 = arith.constant 1 : index
    %c0_301 = arith.constant 0 : index
    %412 = vector.load %arg25[%c1_300, %c0_301] : memref<5x128xf32, #tpu.memory_space<vmem>>, vector<1x128xf32>
    %c1_i32_302 = arith.constant 1 : i32
    %413 = tpu.dynamic_rotate %402 by %c1_i32_302 dim 1 : vector<6x128xf32>, i32 -> vector<6x128xf32>
    %414 = vector.broadcast %412 : vector<1x128xf32> to vector<6x128xf32>
    %415 = arith.mulf %413, %414 : vector<6x128xf32>
    %c12_303 = arith.constant 12 : index
    %c0_304 = arith.constant 0 : index
    %416 = vector.load %arg35[%c12_303, %c0_304] : memref<60x128xf32, #tpu.memory_space<vmem>>, vector<6x128xf32>
    tpu.vector_store %arg35[%c12_303, %c0_304], %415 {strides = array<i32>} : memref<60x128xf32, #tpu.memory_space<vmem>>, vector<6x128xf32>,
    %c1_i32_305 = arith.constant 1 : i32
    %417 = tpu.dynamic_rotate %100 by %c1_i32_305 dim 1 : vector<6x128xf32>, i32 -> vector<6x128xf32>
    %418 = vector.broadcast %412 : vector<1x128xf32> to vector<6x128xf32>
    %419 = arith.mulf %417, %418 : vector<6x128xf32>
    %c18_306 = arith.constant 18 : index
    %c0_307 = arith.constant 0 : index
    %420 = vector.load %arg35[%c18_306, %c0_307] : memref<60x128xf32, #tpu.memory_space<vmem>>, vector<6x128xf32>
    tpu.vector_store %arg35[%c18_306, %c0_307], %419 {strides = array<i32>} : memref<60x128xf32, #tpu.memory_space<vmem>>, vector<6x128xf32>,
    %c2_308 = arith.constant 2 : index
    %c0_309 = arith.constant 0 : index
    %421 = vector.load %arg25[%c2_308, %c0_309] : memref<5x128xf32, #tpu.memory_space<vmem>>, vector<1x128xf32>
    %422 = vector.broadcast %421 : vector<1x128xf32> to vector<6x128xf32>
    %423 = arith.mulf %402, %422 : vector<6x128xf32>
    %c24_310 = arith.constant 24 : index
    %c0_311 = arith.constant 0 : index
    %424 = vector.load %arg35[%c24_310, %c0_311] : memref<60x128xf32, #tpu.memory_space<vmem>>, vector<6x128xf32>
    tpu.vector_store %arg35[%c24_310, %c0_311], %423 {strides = array<i32>} : memref<60x128xf32, #tpu.memory_space<vmem>>, vector<6x128xf32>,
    %425 = vector.broadcast %421 : vector<1x128xf32> to vector<6x128xf32>
    %426 = arith.mulf %100, %425 : vector<6x128xf32>
    %c30_312 = arith.constant 30 : index
    %c0_313 = arith.constant 0 : index
    %427 = vector.load %arg35[%c30_312, %c0_313] : memref<60x128xf32, #tpu.memory_space<vmem>>, vector<6x128xf32>
    tpu.vector_store %arg35[%c30_312, %c0_313], %426 {strides = array<i32>} : memref<60x128xf32, #tpu.memory_space<vmem>>, vector<6x128xf32>,
    %c3_314 = arith.constant 3 : index
    %c0_315 = arith.constant 0 : index
    %428 = vector.load %arg25[%c3_314, %c0_315] : memref<5x128xf32, #tpu.memory_space<vmem>>, vector<1x128xf32>
    %c127_i32_316 = arith.constant 127 : i32
    %429 = tpu.dynamic_rotate %402 by %c127_i32_316 dim 1 : vector<6x128xf32>, i32 -> vector<6x128xf32>
    %430 = vector.broadcast %428 : vector<1x128xf32> to vector<6x128xf32>
    %431 = arith.mulf %429, %430 : vector<6x128xf32>
    %c36_317 = arith.constant 36 : index
    %c0_318 = arith.constant 0 : index
    %432 = vector.load %arg35[%c36_317, %c0_318] : memref<60x128xf32, #tpu.memory_space<vmem>>, vector<6x128xf32>
    tpu.vector_store %arg35[%c36_317, %c0_318], %431 {strides = array<i32>} : memref<60x128xf32, #tpu.memory_space<vmem>>, vector<6x128xf32>,
    %c127_i32_319 = arith.constant 127 : i32
    %433 = tpu.dynamic_rotate %100 by %c127_i32_319 dim 1 : vector<6x128xf32>, i32 -> vector<6x128xf32>
    %434 = vector.broadcast %428 : vector<1x128xf32> to vector<6x128xf32>
    %435 = arith.mulf %433, %434 : vector<6x128xf32>
    %c42_320 = arith.constant 42 : index
    %c0_321 = arith.constant 0 : index
    %436 = vector.load %arg35[%c42_320, %c0_321] : memref<60x128xf32, #tpu.memory_space<vmem>>, vector<6x128xf32>
    tpu.vector_store %arg35[%c42_320, %c0_321], %435 {strides = array<i32>} : memref<60x128xf32, #tpu.memory_space<vmem>>, vector<6x128xf32>,
    %c4_322 = arith.constant 4 : index
    %c0_323 = arith.constant 0 : index
    %437 = vector.load %arg25[%c4_322, %c0_323] : memref<5x128xf32, #tpu.memory_space<vmem>>, vector<1x128xf32>
    %c126_i32_324 = arith.constant 126 : i32
    %438 = tpu.dynamic_rotate %402 by %c126_i32_324 dim 1 : vector<6x128xf32>, i32 -> vector<6x128xf32>
    %439 = vector.broadcast %437 : vector<1x128xf32> to vector<6x128xf32>
    %440 = arith.mulf %438, %439 : vector<6x128xf32>
    %c48_325 = arith.constant 48 : index
    %c0_326 = arith.constant 0 : index
    %441 = vector.load %arg35[%c48_325, %c0_326] : memref<60x128xf32, #tpu.memory_space<vmem>>, vector<6x128xf32>
    tpu.vector_store %arg35[%c48_325, %c0_326], %440 {strides = array<i32>} : memref<60x128xf32, #tpu.memory_space<vmem>>, vector<6x128xf32>,
    %c126_i32_327 = arith.constant 126 : i32
    %442 = tpu.dynamic_rotate %100 by %c126_i32_327 dim 1 : vector<6x128xf32>, i32 -> vector<6x128xf32>
    %443 = vector.broadcast %437 : vector<1x128xf32> to vector<6x128xf32>
    %444 = arith.mulf %442, %443 : vector<6x128xf32>
    %c54_328 = arith.constant 54 : index
    %c0_329 = arith.constant 0 : index
    %445 = vector.load %arg35[%c54_328, %c0_329] : memref<60x128xf32, #tpu.memory_space<vmem>>, vector<6x128xf32>
    tpu.vector_store %arg35[%c54_328, %c0_329], %444 {strides = array<i32>} : memref<60x128xf32, #tpu.memory_space<vmem>>, vector<6x128xf32>,
    %c0_330 = arith.constant 0 : index
    %c0_331 = arith.constant 0 : index
    %446 = vector.load %arg35[%c0_330, %c0_331] : memref<60x128xf32, #tpu.memory_space<vmem>>, vector<60x128xf32>
    %c0_332 = arith.constant 0 : index
    %c0_333 = arith.constant 0 : index
    %447 = vector.load %arg16[%c0_332, %c0_333] : memref<8x60xf32, #tpu.memory_space<vmem>>, vector<8x60xf32>
    %cst_334 = arith.constant dense<0.000000e+00> : vector<8x128xf32>
    %448 = tpu.matmul %447, %446, %cst_334 {dimension_numbers = #tpu.dot_dimension_numbers<[1], [0], [0], [1], [0, 0, 1, 1], [], []>} : vector<8x60xf32>, vector<60x128xf32>, vector<8x128xf32> -> vector<8x128xf32>
    %cst_335 = arith.constant dense<0.000000e+00> : vector<8xf32>
    %449 = vector.multi_reduction <add>, %448, %cst_335 [1] : vector<8x128xf32> to vector<8xf32>
    %450 = vector.shape_cast %449 : vector<8xf32> to vector<8x1xf32>
    %cst_336 = arith.constant 7.812500e-03 : f32
    %451 = vector.broadcast %cst_336 : f32 to vector<8x1xf32>
    %452 = arith.mulf %450, %451 : vector<8x1xf32>
    %453 = arith.mulf %448, %448 : vector<8x128xf32>
    %cst_337 = arith.constant dense<0.000000e+00> : vector<8xf32>
    %454 = vector.multi_reduction <add>, %453, %cst_337 [1] : vector<8x128xf32> to vector<8xf32>
    %455 = vector.shape_cast %454 : vector<8xf32> to vector<8x1xf32>
    %cst_338 = arith.constant 7.812500e-03 : f32
    %456 = vector.broadcast %cst_338 : f32 to vector<8x1xf32>
    %457 = arith.mulf %455, %456 : vector<8x1xf32>
    %458 = arith.mulf %452, %452 : vector<8x1xf32>
    %459 = arith.subf %457, %458 : vector<8x1xf32>
    %c0_339 = arith.constant 0 : index
    %c0_340 = arith.constant 0 : index
    %460 = vector.load %arg17[%c0_339, %c0_340] : memref<8x1xf32, #tpu.memory_space<vmem>>, vector<8x1xf32>
    %cst_341 = arith.constant 9.99999974E-6 : f32
    %461 = vector.broadcast %cst_341 : f32 to vector<8x1xf32>
    %462 = arith.addf %459, %461 : vector<8x1xf32>
    %463 = math.rsqrt %462 : vector<8x1xf32>
    %464 = arith.mulf %460, %463 : vector<8x1xf32>
    %c0_342 = arith.constant 0 : index
    %c0_343 = arith.constant 0 : index
    %465 = vector.load %arg18[%c0_342, %c0_343] : memref<8x1xf32, #tpu.memory_space<vmem>>, vector<8x1xf32>
    %466 = arith.mulf %452, %464 : vector<8x1xf32>
    %467 = arith.subf %465, %466 : vector<8x1xf32>
    %468 = vector.broadcast %464 : vector<8x1xf32> to vector<8x128xf32>
    %469 = arith.mulf %448, %468 : vector<8x128xf32>
    %470 = vector.broadcast %467 : vector<8x1xf32> to vector<8x128xf32>
    %471 = arith.addf %469, %470 : vector<8x128xf32>
    %472 = arith.addf %471, %50 : vector<8x128xf32>
    %c0_344 = arith.constant 0 : index
    %c0_345 = arith.constant 0 : index
    %473 = vector.load %arg34[%c0_344, %c0_345] : memref<8x128xf32, #tpu.memory_space<vmem>>, vector<8x128xf32>
    tpu.vector_store %arg34[%c0_344, %c0_345], %472 {strides = array<i32>} : memref<8x128xf32, #tpu.memory_space<vmem>>, vector<8x128xf32>,
    return
  }
}

</mosaic_0001>

<bundles_post_ra>
// kernel: _lambda_.1
= control target key start
LH: loop header
LB: loop body
LE: loop exit
PB: predicated region body
PF: predicated region fallthrough
CT: control target
= control target key end

     0   :  { %s2578_s6 = smov 25   ;;  %v2579_v0 = vmov 0.0   ;;  %s2580_s10 = smov 2   ;;  %vm2582_vm0 = vmmov 0   ;;  %vm194_vm1 = vcmask 1043456   ;;  %vm190_vm2 = vcmask 162816   ;;  %s3206_s0 = inlined_call_operand.smem [shape: u32[35], index: -1, kind: input, shape index: {}] }
   0x1   :  { %s1_s5 = sld [smem:[%s3206_s0]]   ;;  %2199 = vmatprep.subr.mxu0 %v2579_v0  ;;  %2208 = vmatprep.subr.mxu1 %v2579_v0  ;;  %s2581_s11 = smov 126   ;;  %v2585_v23 = vmov 0   ;;  %vm345_vm3 = vcmask 326656   ;;  %vm419_vm4 = vcmask 1045504   ;;  %vm671_vm5 = vcmask 244736  }
   0x2   :  { %s2628_s9 = sld [smem:[%s3206_s0 + %s2578_s6]]   ;;  %2205 = vmatprep.mubr.msk.f32.mxu0 %vm2582_vm0, %v2579_v0  ;;  %2218 = vmatprep.mubr.msk.f32.mxu1 %vm2582_vm0, %v2579_v0  ;;  %s2583_s12 = smov 1   ;;  %vm1321_vm6 = vcmask 490496  }
   0x3   :  { %s2584_s13 = smov 127   ;;  %s1956_s16 = sld [smem:[%s3206_s0 + %s2583_s12]]   ;;  %2560 = vset.pattern.permute.xlu0 %v2585_v23  ;;  %2561 = vset.pattern.permute.xlu1 %v2585_v23 }
   0x4   :  { %s1957_s19 = sld [smem:[%s3206_s0 + %s2580_s10]]   ;;  %s2586_s20 = smov 3  }
   0x5   :  { %s1958_s23 = sld [smem:[%s3206_s0 + %s2586_s20]]   ;;  %s2587_s24 = smov 4  }
   0x6   :  { %s1959_s27 = sld [smem:[%s3206_s0 + %s2587_s24]]   ;;  %s2588_s28 = smov 28  }
   0x7   :  { %v142_v1 = vld [vmem:[%s1_s5] sm:$0xf]  ;;  %s2713_s1 = sld [smem:[%s3206_s0 + %s2588_s28]]   ;;  %s2589_s2 = smov 29  }
   0x8   :  { %v2633_v2 = vld [vmem:[%s2628_s9 + $0x2] ss:$0 sm:$0xff]  ;;  %144 = vrot.lane.b32.xlu1 %v142_v1, %s2580_s10  ;;  %178 = vrot.lane.b32.xlu0 %v142_v1, %s2581_s11  ;;  %v2645_v4 = vld [vmem:[%s2628_s9] ss:$0 sm:$0xff]  ;;  %s2718_s5 = sld [smem:[%s3206_s0 + %s2589_s2]]   ;;  %s2590_s6 = smov 5  }
   0x9   :  { %v166_v3 = vmul.f32 %v2633_v2, %v142_v1  ;;  %v2648_v5 = vld [vmem:[%s2628_s9 + $0x4] ss:$0 sm:$0xff]  ;;  %v2653_v10 = vld [vmem:[%s2628_s9 + $0x1] ss:$0 sm:$0xff]  ;;  %v2656_v11 = vld [vmem:[%s2628_s9 + $0x3] ss:$0 sm:$0xff]  ;;  %s1960_s14 = sld [smem:[%s3206_s0 + %s2590_s6]]  }
   0xa   :  { %v189_v18 = vld [vmem:[%s1956_s16] sm:$0xff]  ;;  %s2591_s15 = smov 6  }
   0xb   :  { %167 = vst [vmem:[#allocation2 + $0x8] sm:$0xf] %v166_v3  ;;  %v277_v31 = vld [vmem:[%s1957_s19] sm:$0xff]  ;;  %s1961_s18 = sld [smem:[%s3206_s0 + %s2591_s15]]   ;;  %s2592_s19 = smov 26  }
   0xc   :  { %153 = vrot.lane.b32.xlu1 %v142_v1, %s2583_s12  ;;  %169 = vrot.lane.b32.xlu0 %v142_v1, %s2584_s13  ;;  %v281_v34 = vld [vmem:[%s1958_s23] sm:$0xff]  ;;  %s1981_s22 = sld [smem:[%s3206_s0 + %s2592_s19]]   ;;  %s2593_s23 = smov 7  }
   0xd   :  { %v344_v50 = vld [vmem:[%s1959_s27] sm:$0x3f]  ;;  %v465_v56 = vld [vmem:[%s2713_s1 + $0x78] sm:$0xff]  ;;  %v464_v57 = vld [vmem:[%s2713_s1 + $0x70] sm:$0xff]  ;;  %s1962_s26 = sld [smem:[%s3206_s0 + %s2593_s23]]   ;;  %s2594_s27 = smov 30  }
   0xe   :  { %v551_v58 = vld [vmem:[%s2718_s5 + $0x78] sm:$0xff]  ;;  %v550_v59 = vld [vmem:[%s2718_s5 + $0x70] sm:$0xff]  ;;  %v463_v60 = vld [vmem:[%s2713_s1 + $0x68] sm:$0xff]  ;;  %s2842_s30 = sld [smem:[%s3206_s0 + %s2594_s27]]  }
   0xf   :  { %v549_v61 = vld [vmem:[%s2718_s5 + $0x68] sm:$0xff]  ;;  %v462_v62 = vld [vmem:[%s2713_s1 + $0x60] sm:$0xff]  ;;  %v461_v1 = vld [vmem:[%s2713_s1 + $0x58] sm:$0xff] }
  0x10   :  { %v548_v63 = vld [vmem:[%s2718_s5 + $0x60] sm:$0xff]  ;;  %v460_v3 = vld [vmem:[%s2713_s1 + $0x50] sm:$0xff] }
  0x7a   :  { %v145_v6 = vpop.permute.xlu1 %144  ;;  %v179_v7 = vpop.permute.xlu0 %178 }
  0x7b   :  { %v150_v8 = vmul.f32 %v2645_v4, %v145_v6  ;;  %v184_v9 = vmul.f32 %v2648_v5, %v179_v7  ;;  %v545_v6 = vld [vmem:[%s2718_s5 + $0x48] sm:$0xff]  ;;  %v458_v7 = vld [vmem:[%s2713_s1 + $0x40] sm:$0xff] }
  0x7d   :  { %151 = vst [vmem:[#allocation2] sm:$0xf] %v150_v8  ;;  %185 = vst [vmem:[#allocation2 + $0x10] sm:$0xf] %v184_v9  ;;  %v544_v8 = vld [vmem:[%s2718_s5 + $0x40] sm:$0xff]  ;;  %v457_v9 = vld [vmem:[%s2713_s1 + $0x38] sm:$0xff] }
  0x7e   :  { %v154_v12 = vpop.permute.xlu1 %153  ;;  %v170_v13 = vpop.permute.xlu0 %169 }
  0x7f   :  { %v159_v14 = vmul.f32 %v2653_v10, %v154_v12  ;;  %v175_v15 = vmul.f32 %v2656_v11, %v170_v13  ;;  %v542_v12 = vld [vmem:[%s2718_s5 + $0x30] sm:$0xff]  ;;  %v455_v13 = vld [vmem:[%s2713_s1 + $0x28] sm:$0xff] }
  0x81   :  { %160 = vst [vmem:[#allocation2 + $0x4] sm:$0xf] %v159_v14  ;;  %176 = vst [vmem:[#allocation2 + $0xc] sm:$0xf] %v175_v15  ;;  %v541_v14 = vld [vmem:[%s2718_s5 + $0x28] sm:$0xff]  ;;  %v454_v15 = vld [vmem:[%s2713_s1 + $0x20] sm:$0xff] }
  0x84   :  { %v188_v16 = vld [vmem:[#allocation2 + $0x10] sm:$0xf] }
  0x85   :  { %2200 = vmatpush3.msk.msra.mxu0 %vm194_vm1, %v188_v16  ;;  %v540_v16 = vld [vmem:[%s2718_s5 + $0x20] sm:$0xff] }
  0x86   :  { %2201 = vmatprep.subr.mxu0 %v2579_v0 }
  0x88   :  { %v187_v17 = vld [vmem:[#allocation2 + $0x8] sm:$0xff]  ;;  %v186_v19 = vld [vmem:[#allocation2] sm:$0xff] }
  0x89   :  { %2202 = vmatpush3.msra.mxu0 %v187_v17  ;;  %v453_v17 = vld [vmem:[%s2713_s1 + $0x18] sm:$0xff] }
  0x8a   :  { %2203 = vmatprep.subr.mxu0 %v2579_v0 }
  0x8b   :  { %2204 = vmatpush3.msra.mxu0 %v186_v19 }
  0x8c   :  { %2206 = vmatmul.mubr.msk.f32.vlgmr.msra.gmra.mxu0 %vm190_vm2, %v189_v18  ;;  %2221 = vmatprep.subr.mxu0 %v2579_v0  ;;  %v539_v18 = vld [vmem:[%s2718_s5 + $0x18] sm:$0xff] }
  0x8d   :  { %2253 = vmatprep.mubr.msk.f32.mxu0 %vm2582_vm0, %v2579_v0  ;;  %2222 = vmatpush3.msra.mxu0 %v465_v56  ;;  %v2815_v56 = vld [vmem:[%s1981_s22 + $0x3] ss:$0 sm:$0xff] }
  0x8e   :  { %2223 = vmatprep.subr.mxu0 %v2579_v0 }
  0x8f   :  { %2224 = vmatpush3.msra.mxu0 %v464_v57 }
  0x90   :  { %2225 = vmatprep.subr.mxu0 %v2579_v0 }
  0x91   :  { %2226 = vmatpush3.msra.mxu0 %v463_v60 }
  0x92   :  { %2227 = vmatprep.subr.mxu0 %v2579_v0 }
  0x93   :  { %2228 = vmatpush3.msra.mxu0 %v462_v62 }
  0x94   :  { %2229 = vmatprep.subr.mxu0 %v2579_v0 }
  0x95   :  { %2230 = vmatpush3.msra.mxu0 %v461_v1 }
  0x96   :  { %2231 = vmatprep.subr.mxu0 %v2579_v0 }
  0x97   :  { %2232 = vmatpush3.msra.mxu0 %v460_v3 }
  0x98   :  { %2233 = vmatprep.subr.mxu0 %v2579_v0 }
 0x14c   :  { %v264_v20 = vpop.f32.mrf.mxu0 }
 0x14d   :  { %268 = vadd.xlane.f32.xlu0 %v264_v20  ;;  %v271_v21 = vmul.f32 %v264_v20, %v264_v20 }
 0x14e   :  { %v2207_v22 = vpop.f32.mrf.mxu0 }
 0x14f   :  { %272 = vadd.xlane.f32.xlu1 %v271_v21 }
 0x1d6   :  { %v269_v24 = vpop.xlane.xlu0 %268 }
 0x1d7   :  { %v270_v25 = vmul.f32 0.0078125, %v269_v24 }
 0x1d8   :  { %v273_v26 = vpop.xlane.xlu1 %272 }
 0x1d9   :  { %v275_v27 = vmul.f32 %v270_v25, %v270_v25  ;;  %v274_v28 = vmul.f32 0.0078125, %v273_v26  ;;  %v431_v26 = vld [vmem:[%s1960_s14] sm:$0x3f]  ;;  %s2597_s14 = smov 9  }
 0x1da   :  { %s1964_s17 = sld [smem:[%s3206_s0 + %s2597_s14]]  }
 0x1db   :  { %v276_v29 = vsub.f32 %v274_v28, %v275_v27  ;;  %v452_v27 = vld [vmem:[%s2713_s1 + $0x10] sm:$0xff] }
 0x1dc   :  { %v538_v28 = vld [vmem:[%s2718_s5 + $0x10] sm:$0xff] }
 0x1dd   :  { %v278_v30 = vadd.f32 1e-05, %v276_v29  ;;  %v451_v29 = vld [vmem:[%s2713_s1 + $0x8] sm:$0xff] }
 0x1df   :  { %2562 = vrsqrt.f32 %v278_v30 }
 0x1ec   :  { %v2563_v32 = vpop.eup %2562 }
 0x1ed   :  { %v280_v33 = vmul.f32 %v2563_v32, %v277_v31  ;;  %v537_v31 = vld [vmem:[%s2718_s5 + $0x8] sm:$0xff] }
 0x1ef   :  { %286 = vperm.xlu0 %2560, %v280_v33   ;;  %v282_v35 = vmul.f32 %v280_v33, %v270_v25  ;;  %v435_v33 = vld [vmem:[%s1961_s18] sm:$0x3f]  ;;  %s2598_s18 = smov 27  }
 0x1f0   :  { %s1982_s21 = sld [smem:[%s3206_s0 + %s2598_s18]]  }
 0x1f1   :  { %v283_v36 = vsub.f32 %v281_v34, %v282_v35  ;;  %v450_v35 = vld [vmem:[%s2713_s1] sm:$0xff] }
 0x1f3   :  { %292 = vperm.xlu1 %2561, %v283_v36   ;;  %v536_v36 = vld [vmem:[%s2718_s5] sm:$0xff] }
 0x26a   :  { %v287_v37 = vpop.permute.xlu0 %286 }
 0x26b   :  { %v289_v38 = vmul.f32 %v287_v37, %v264_v20 }
 0x26e   :  { %v293_v39 = vpop.permute.xlu1 %292 }
 0x26f   :  { %v2677_v40 = vadd.f32 %v293_v39, %v289_v38 }
 0x271   :  { %v319_v41 = vmul.f32 %v2633_v2, %v2677_v40  ;;  %331 = vrot.lane.b32.xlu1 %v2677_v40, %s2581_s11  ;;  %v547_v2 = vld [vmem:[%s2718_s5 + $0x58] sm:$0xff] }
 0x273   :  { %320 = vst [vmem:[#allocation2 + $0x10] sm:$0xff] %v319_v41 }
 0x275   :  { %322 = vrot.lane.b32.xlu1 %v2677_v40, %s2584_s13 }
 0x279   :  { %306 = vrot.lane.b32.xlu1 %v2677_v40, %s2583_s12 }
 0x27d   :  { %297 = vrot.lane.b32.xlu1 %v2677_v40, %s2580_s10 }
 0x2e3   :  { %v332_v42 = vpop.permute.xlu1 %331 }
 0x2e4   :  { %v337_v43 = vmul.f32 %v2648_v5, %v332_v42  ;;  %v459_v5 = vld [vmem:[%s2713_s1 + $0x48] sm:$0xff] }
 0x2e5   :  { %2234 = vmatpush3.msra.mxu0 %v459_v5 }
 0x2e6   :  { %338 = vst [vmem:[#allocation2 + $0x20] sm:$0xff] %v337_v43  ;;  %2209 = vmatpush3.msra.mxu1 %v337_v43  ;;  %2235 = vmatprep.subr.mxu0 %v2579_v0 }
 0x2e7   :  { %v323_v44 = vpop.permute.xlu1 %322  ;;  %2210 = vmatprep.subr.mxu1 %v2579_v0  ;;  %2236 = vmatpush3.msra.mxu0 %v458_v7 }
 0x2e8   :  { %v328_v45 = vmul.f32 %v2656_v11, %v323_v44  ;;  %2237 = vmatprep.subr.mxu0 %v2579_v0  ;;  %v456_v11 = vld [vmem:[%s2713_s1 + $0x30] sm:$0xff]  ;;  %s2595_s1 = smov 31  }
 0x2e9   :  { %2238 = vmatpush3.msra.mxu0 %v457_v9  ;;  %s2847_s4 = sld [smem:[%s3206_s0 + %s2595_s1]]   ;;  %v793_v9 = vld [vmem:[%s2842_s30 + $0x78] sm:$0xff]  ;;  %s2615_s1 = smov 18  }
 0x2ea   :  { %329 = vst [vmem:[#allocation2 + $0x18] sm:$0xff] %v328_v45  ;;  %2211 = vmatpush3.msra.mxu1 %v328_v45  ;;  %2239 = vmatprep.subr.mxu0 %v2579_v0  ;;  %v2802_v45 = vld [vmem:[%s1981_s22 + $0x2] ss:$0 sm:$0xff] }
 0x2eb   :  { %v307_v46 = vpop.permute.xlu1 %306  ;;  %2212 = vmatprep.subr.mxu1 %v2579_v0  ;;  %2240 = vmatpush3.msra.mxu0 %v456_v11 }
 0x2ec   :  { %v312_v47 = vmul.f32 %v2653_v10, %v307_v46  ;;  %2213 = vmatpush3.msra.mxu1 %v319_v41  ;;  %v543_v10 = vld [vmem:[%s2718_s5 + $0x38] sm:$0xff]  ;;  %2241 = vmatprep.subr.mxu0 %v2579_v0 }
 0x2ed   :  { %2214 = vmatprep.subr.mxu1 %v2579_v0  ;;  %2242 = vmatpush3.msra.mxu0 %v455_v13  ;;  %v791_v13 = vld [vmem:[%s2842_s30 + $0x68] sm:$0xff] }
 0x2ee   :  { %313 = vst [vmem:[#allocation2 + $0x8] sm:$0xff] %v312_v47  ;;  %2215 = vmatpush3.msra.mxu1 %v312_v47  ;;  %2243 = vmatprep.subr.mxu0 %v2579_v0 }
 0x2ef   :  { %v298_v48 = vpop.permute.xlu1 %297  ;;  %2216 = vmatprep.subr.mxu1 %v2579_v0  ;;  %2244 = vmatpush3.msra.mxu0 %v454_v15  ;;  %v879_v11 = vld [vmem:[%s2847_s4 + $0x78] sm:$0xff]  ;;  %v790_v15 = vld [vmem:[%s2842_s30 + $0x60] sm:$0xff] }
 0x2f0   :  { %v303_v49 = vmul.f32 %v2645_v4, %v298_v48  ;;  %v546_v4 = vld [vmem:[%s2718_s5 + $0x50] sm:$0xff]  ;;  %2245 = vmatprep.subr.mxu0 %v2579_v0  ;;  %s2596_s5 = smov 8  }
 0x2f1   :  { %2246 = vmatpush3.msra.mxu0 %v453_v17  ;;  %v789_v17 = vld [vmem:[%s2842_s30 + $0x58] sm:$0xff]  ;;  %s1963_s8 = sld [smem:[%s3206_s0 + %s2596_s5]]   ;;  %s2616_s5 = smov 34  }
 0x2f2   :  { %304 = vst [vmem:[#allocation2] sm:$0xff] %v303_v49  ;;  %2217 = vmatpush3.msra.mxu1 %v303_v49  ;;  %2247 = vmatprep.subr.mxu0 %v2579_v0 }
 0x2f3   :  { %2219 = vmatmul.mubr.msk.f32.vlgmr.msra.gmra.mxu1 %vm345_vm3, %v344_v50  ;;  %2256 = vmatprep.subr.mxu1 %v2579_v0  ;;  %v2809_v50 = vld [vmem:[%s1981_s22 + $0x1] ss:$0 sm:$0xff] }
 0x2f4   :  { %2288 = vmatprep.mubr.msk.f32.mxu1 %vm2582_vm0, %v2579_v0  ;;  %2257 = vmatpush3.msra.mxu1 %v551_v58 }
 0x2f5   :  { %2258 = vmatprep.subr.mxu1 %v2579_v0  ;;  %2248 = vmatpush3.msra.mxu0 %v452_v27  ;;  %v784_v27 = vld [vmem:[%s2842_s30 + $0x30] sm:$0xff] }
 0x2f6   :  { %2259 = vmatpush3.msra.mxu1 %v550_v59  ;;  %2249 = vmatprep.subr.mxu0 %v2579_v0  ;;  %v2818_v59 = vld [vmem:[%s1981_s22] ss:$0 sm:$0xff] }
 0x2f7   :  { %2260 = vmatprep.subr.mxu1 %v2579_v0  ;;  %2250 = vmatpush3.msra.mxu0 %v451_v29  ;;  %v783_v29 = vld [vmem:[%s2842_s30 + $0x28] sm:$0xff] }
 0x2f8   :  { %2261 = vmatpush3.msra.mxu1 %v549_v61  ;;  %2251 = vmatprep.subr.mxu0 %v2579_v0 }
 0x2f9   :  { %2262 = vmatprep.subr.mxu1 %v2579_v0  ;;  %2252 = vmatpush3.msra.mxu0 %v450_v35 }
 0x2fa   :  { %2263 = vmatpush3.msra.mxu1 %v548_v63  ;;  %2291 = vmatprep.subr.mxu0 %v2579_v0 }
 0x2fb   :  { %2264 = vmatprep.subr.mxu1 %v2579_v0 }
 0x2fc   :  { %2265 = vmatpush3.msra.mxu1 %v547_v2  ;;  %v670_v2 = vld [vmem:[%s1962_s26] sm:$0x3f]  ;;  %s2600_s26 = smov 11  }
 0x2fd   :  { %2266 = vmatprep.subr.mxu1 %v2579_v0  ;;  %s1966_s29 = sld [smem:[%s3206_s0 + %s2600_s26]]  }
 0x2fe   :  { %2267 = vmatpush3.msra.mxu1 %v546_v4 }
 0x2ff   :  { %2268 = vmatprep.subr.mxu1 %v2579_v0 }
 0x300   :  { %2269 = vmatpush3.msra.mxu1 %v545_v6 }
 0x301   :  { %2270 = vmatprep.subr.mxu1 %v2579_v0 }
 0x302   :  { %2271 = vmatpush3.msra.mxu1 %v544_v8 }
 0x303   :  { %2272 = vmatprep.subr.mxu1 %v2579_v0 }
 0x304   :  { %2273 = vmatpush3.msra.mxu1 %v543_v10  ;;  %v792_v10 = vld [vmem:[%s2842_s30 + $0x70] sm:$0xff] }
 0x305   :  { %2274 = vmatprep.subr.mxu1 %v2579_v0 }
 0x306   :  { %2275 = vmatpush3.msra.mxu1 %v542_v12  ;;  %v878_v12 = vld [vmem:[%s2847_s4 + $0x70] sm:$0xff] }
 0x307   :  { %2276 = vmatprep.subr.mxu1 %v2579_v0 }
 0x308   :  { %2277 = vmatpush3.msra.mxu1 %v541_v14  ;;  %v877_v14 = vld [vmem:[%s2847_s4 + $0x68] sm:$0xff] }
 0x309   :  { %2278 = vmatprep.subr.mxu1 %v2579_v0 }
 0x30a   :  { %2279 = vmatpush3.msra.mxu1 %v540_v16  ;;  %v876_v16 = vld [vmem:[%s2847_s4 + $0x60] sm:$0xff] }
 0x30b   :  { %2280 = vmatprep.subr.mxu1 %v2579_v0 }
 0x30c   :  { %2281 = vmatpush3.msra.mxu1 %v539_v18  ;;  %v875_v18 = vld [vmem:[%s2847_s4 + $0x58] sm:$0xff] }
 0x30d   :  { %2282 = vmatprep.subr.mxu1 %v2579_v0 }
 0x30e   :  { %2283 = vmatpush3.msra.mxu1 %v538_v28  ;;  %v870_v28 = vld [vmem:[%s2847_s4 + $0x30] sm:$0xff] }
 0x30f   :  { %2284 = vmatprep.subr.mxu1 %v2579_v0 }
 0x310   :  { %2285 = vmatpush3.msra.mxu1 %v537_v31  ;;  %v782_v31 = vld [vmem:[%s2842_s30 + $0x20] sm:$0xff] }
 0x311   :  { %2286 = vmatprep.subr.mxu1 %v2579_v0 }
 0x312   :  { %2287 = vmatpush3.msra.mxu1 %v536_v36 }
 0x313   :  { %2302 = vmatprep.subr.mxu1 %v2579_v0 }
 0x3b3   :  { %v2703_v51 = vpop.f32.mrf.mxu1 }
 0x3b4   :  { %v420_v52 = vsel %vm419_vm4, %v2703_v51, 0.0  ;;  %v424_v53 = vmul.f32 %v2703_v51, %v2703_v51 }
 0x3b5   :  { %421 = vadd.xlane.f32.xlu1 %v420_v52  ;;  %v2220_v54 = vpop.f32.mrf.mxu1 }
 0x3b6   :  { %v425_v55 = vsel %vm419_vm4, %v424_v53, 0.0 }
 0x3b7   :  { %426 = vadd.xlane.f32.xlu0 %v425_v55 }
 0x43e   :  { %v422_v19 = vpop.xlane.xlu1 %421 }
 0x43f   :  { %v423_v20 = vmul.f32 0.0078125, %v422_v19  ;;  %v788_v19 = vld [vmem:[%s2842_s30 + $0x50] sm:$0xff] }
 0x440   :  { %v427_v21 = vpop.xlane.xlu0 %426 }
 0x441   :  { %v429_v22 = vmul.f32 %v423_v20, %v423_v20  ;;  %v428_v23 = vmul.f32 0.0078125, %v427_v21  ;;  %v787_v21 = vld [vmem:[%s2842_s30 + $0x48] sm:$0xff] }
 0x443   :  { %v430_v24 = vsub.f32 %v428_v23, %v429_v22  ;;  %v873_v22 = vld [vmem:[%s2847_s4 + $0x48] sm:$0xff]  ;;  %v786_v23 = vld [vmem:[%s2842_s30 + $0x40] sm:$0xff] }
 0x445   :  { %v432_v25 = vadd.f32 1e-05, %v430_v24  ;;  %v872_v24 = vld [vmem:[%s2847_s4 + $0x40] sm:$0xff] }
 0x447   :  { %2564 = vrsqrt.f32 %v432_v25  ;;  %v785_v25 = vld [vmem:[%s2842_s30 + $0x38] sm:$0xff] }
 0x454   :  { %v2565_v30 = vpop.eup %2564 }
 0x455   :  { %v434_v32 = vmul.f32 %v2565_v30, %v431_v26  ;;  %v871_v26 = vld [vmem:[%s2847_s4 + $0x38] sm:$0xff]  ;;  %v869_v30 = vld [vmem:[%s2847_s4 + $0x28] sm:$0xff] }
 0x457   :  { %440 = vperm.xlu1 %2561, %v434_v32   ;;  %v436_v34 = vmul.f32 %v434_v32, %v423_v20  ;;  %v874_v20 = vld [vmem:[%s2847_s4 + $0x50] sm:$0xff]  ;;  %v868_v32 = vld [vmem:[%s2847_s4 + $0x20] sm:$0xff] }
 0x459   :  { %v437_v37 = vsub.f32 %v435_v33, %v436_v34  ;;  %v781_v33 = vld [vmem:[%s2842_s30 + $0x18] sm:$0xff] }
 0x45a   :  { %v867_v34 = vld [vmem:[%s2847_s4 + $0x18] sm:$0xff] }
 0x45b   :  { %446 = vperm.xlu0 %2560, %v437_v37  }
 0x4d2   :  { %v441_v38 = vpop.permute.xlu1 %440 }
 0x4d3   :  { %v443_v39 = vmul.f32 %v441_v38, %v2703_v51  ;;  %v2811_v51 = vld [vmem:[%s1981_s22 + $0x4] ss:$0 sm:$0xff]  ;;  %s2599_s22 = smov 10  }
 0x4d4   :  { %s1965_s25 = sld [smem:[%s3206_s0 + %s2599_s22]]  }
 0x4d6   :  { %v447_v41 = vpop.permute.xlu0 %446 }
 0x4d7   :  { %v2791_v42 = vadd.f32 %v447_v41, %v443_v39 }
 0x4d9   :  { %2254 = vmatmul.mubr.f32.vlgmr.msra.gmra.mxu0 %v2791_v42  ;;  %2289 = vmatmul.mubr.f32.vlgmr.msra.gmra.mxu1 %v2791_v42 }
 0x4da   :  { %2299 = vmatprep.mubr.msk.f32.mxu0 %vm2582_vm0, %v2579_v0  ;;  %2334 = vmatprep.mubr.msk.f32.mxu1 %vm2582_vm0, %v2579_v0 }
 0x4db   :  { %2303 = vmatpush3.msra.mxu1 %v793_v9  ;;  %v2938_v9 = vld [vmem:[%s1982_s21 + $0x3] ss:$0 sm:$0xff] }
 0x4dc   :  { %2304 = vmatprep.subr.mxu1 %v2579_v0 }
 0x4dd   :  { %2305 = vmatpush3.msra.mxu1 %v792_v10  ;;  %v2940_v10 = vld [vmem:[%s1982_s21 + $0x4] ss:$0 sm:$0xff] }
 0x4de   :  { %2306 = vmatprep.subr.mxu1 %v2579_v0 }
 0x4df   :  { %2307 = vmatpush3.msra.mxu1 %v791_v13 }
 0x4e0   :  { %2308 = vmatprep.subr.mxu1 %v2579_v0 }
 0x4e1   :  { %2309 = vmatpush3.msra.mxu1 %v790_v15  ;;  %v2944_v15 = vld [vmem:[%s1982_s21] ss:$0 sm:$0xff] }
 0x4e2   :  { %2310 = vmatprep.subr.mxu1 %v2579_v0 }
 0x4e3   :  { %2311 = vmatpush3.msra.mxu1 %v789_v17 }
 0x4e4   :  { %2312 = vmatprep.subr.mxu1 %v2579_v0 }
 0x4e5   :  { %2313 = vmatpush3.msra.mxu1 %v788_v19 }
 0x4e6   :  { %2314 = vmatprep.subr.mxu1 %v2579_v0 }
 0x4e7   :  { %2315 = vmatpush3.msra.mxu1 %v787_v21 }
 0x4e8   :  { %2316 = vmatprep.subr.mxu1 %v2579_v0 }
 0x4e9   :  { %2317 = vmatpush3.msra.mxu1 %v786_v23 }
 0x4ea   :  { %2318 = vmatprep.subr.mxu1 %v2579_v0 }
 0x4eb   :  { %2319 = vmatpush3.msra.mxu1 %v785_v25 }
 0x4ec   :  { %2320 = vmatprep.subr.mxu1 %v2579_v0 }
 0x4ed   :  { %2321 = vmatpush3.msra.mxu1 %v784_v27 }
 0x4ee   :  { %2322 = vmatprep.subr.mxu1 %v2579_v0 }
 0x4ef   :  { %2323 = vmatpush3.msra.mxu1 %v783_v29 }
 0x4f0   :  { %2324 = vmatprep.subr.mxu1 %v2579_v0 }
 0x4f1   :  { %2325 = vmatpush3.msra.mxu1 %v782_v31 }
 0x4f2   :  { %2326 = vmatprep.subr.mxu1 %v2579_v0 }
 0x4f3   :  { %2327 = vmatpush3.msra.mxu1 %v781_v33 }
 0x4f4   :  { %2328 = vmatprep.subr.mxu1 %v2579_v0 }
 0x599   :  { %v532_v43 = vpop.f32.mrf.mxu0  ;;  %v618_v44 = vpop.f32.mrf.mxu1 }
 0x59a   :  { %v622_v46 = vmax.f32 %v532_v43, %v618_v44  ;;  %v759_v44 = vld [vmem:[%s1963_s8] sm:$0x3f]  ;;  %s2603_s8 = smov 14  }
 0x59b   :  { %v2255_v47 = vpop.f32.mrf.mxu0  ;;  %v2290_v48 = vpop.f32.mrf.mxu1  ;;  %s1969_s16 = sld [smem:[%s3206_s0 + %s2603_s8]]  }
 0x59c   :  { %v646_v49 = vmul.f32 %v2802_v45, %v622_v46  ;;  %633 = vrot.lane.b32.xlu0 %v622_v46, %s2583_s12  ;;  %658 = vrot.lane.b32.xlu1 %v622_v46, %s2581_s11  ;;  %v866_v47 = vld [vmem:[%s2847_s4 + $0x10] sm:$0xff]  ;;  %v779_v48 = vld [vmem:[%s2842_s30 + $0x8] sm:$0xff]  ;;  %s1989_s8 = sld [smem:[%s3206_s0 + %s2616_s5]]  }
 0x59e   :  { %647 = vst [vmem:[#allocation2 + $0xc] sm:$0x3f] %v646_v49 }
 0x5a0   :  { %649 = vrot.lane.b32.xlu1 %v622_v46, %s2584_s13 }
 0x5a4   :  { %624 = vrot.lane.b32.xlu1 %v622_v46, %s2580_s10  ;;  %v780_v46 = vld [vmem:[%s2842_s30 + $0x10] sm:$0xff] }
 0x5a5   :  { %2329 = vmatpush3.msra.mxu1 %v780_v46 }
 0x5a6   :  { %2330 = vmatprep.subr.mxu1 %v2579_v0 }
 0x5a7   :  { %2331 = vmatpush3.msra.mxu1 %v779_v48 }
 0x5a8   :  { %2332 = vmatprep.subr.mxu1 %v2579_v0 }
 0x60e   :  { %v634_v52 = vpop.permute.xlu0 %633  ;;  %v659_v53 = vpop.permute.xlu1 %658 }
 0x60f   :  { %v639_v54 = vmul.f32 %v2809_v50, %v634_v52  ;;  %v664_v55 = vmul.f32 %v2811_v51, %v659_v53  ;;  %v865_v52 = vld [vmem:[%s2847_s4 + $0x8] sm:$0xff] }
 0x611   :  { %640 = vst [vmem:[#allocation2 + $0x6] sm:$0x3f] %v639_v54  ;;  %665 = vst [vmem:[#allocation2 + $0x18] sm:$0x3f] %v664_v55  ;;  %v763_v54 = vld [vmem:[%s1964_s17] sm:$0x3f] }
 0x612   :  { %v650_v57 = vpop.permute.xlu1 %649  ;;  %s2604_s17 = smov 15  }
 0x613   :  { %v655_v58 = vmul.f32 %v2815_v56, %v650_v57  ;;  %v778_v57 = vld [vmem:[%s2842_s30] sm:$0xff]  ;;  %s2601_s30 = smov 12   ;;  %s1970_s20 = sld [smem:[%s3206_s0 + %s2604_s17]]  }
 0x614   :  { %2333 = vmatpush3.msra.mxu1 %v778_v57  ;;  %s1967_s3 = sld [smem:[%s3206_s0 + %s2601_s30]]  }
 0x615   :  { %656 = vst [vmem:[#allocation2 + $0x12] sm:$0x3f] %v655_v58  ;;  %v864_v58 = vld [vmem:[%s2847_s4] sm:$0xff]  ;;  %2394 = vmatprep.subr.mxu1 %v2579_v0  ;;  %s2602_s4 = smov 13  }
 0x616   :  { %v625_v60 = vpop.permute.xlu1 %624  ;;  %s1968_s7 = sld [smem:[%s3206_s0 + %s2602_s4]]  }
 0x617   :  { %v630_v61 = vmul.f32 %v2818_v59, %v625_v60  ;;  %s1973_s4 = sld [smem:[%s3206_s0 + %s2615_s1]]  }
 0x618   :  { %v669_v62 = vld [vmem:[#allocation2 + $0x18] sm:$0x3f]  ;;  %v667_v1 = vld [vmem:[#allocation2 + $0x8] sm:$0xff] }
 0x619   :  { %631 = vst [vmem:[#allocation2] sm:$0x3f] %v630_v61  ;;  %2292 = vmatpush3.msk.msra.mxu0 %vm419_vm4, %v669_v62 }
 0x61a   :  { %2293 = vmatprep.subr.mxu0 %v2579_v0 }
 0x61c   :  { %v668_v63 = vld [vmem:[#allocation2 + $0x10] sm:$0xff] }
 0x61d   :  { %2294 = vmatpush3.msra.mxu0 %v668_v63 }
 0x61e   :  { %2295 = vmatprep.subr.mxu0 %v2579_v0 }
 0x61f   :  { %2296 = vmatpush3.msra.mxu0 %v667_v1 }
 0x620   :  { %2297 = vmatprep.subr.mxu0 %v2579_v0  ;;  %v666_v3 = vld [vmem:[#allocation2] sm:$0xff] }
 0x621   :  { %2298 = vmatpush3.msra.mxu0 %v666_v3 }
 0x622   :  { %2300 = vmatmul.mubr.msk.f32.vlgmr.msra.gmra.mxu0 %vm671_vm5, %v670_v2  ;;  %2337 = vmatprep.subr.mxu0 %v2579_v0 }
 0x623   :  { %2369 = vmatprep.mubr.msk.f32.mxu0 %vm2582_vm0, %v2579_v0  ;;  %2338 = vmatpush3.msra.mxu0 %v879_v11 }
 0x624   :  { %2339 = vmatprep.subr.mxu0 %v2579_v0 }
 0x625   :  { %2340 = vmatpush3.msra.mxu0 %v878_v12 }
 0x626   :  { %2341 = vmatprep.subr.mxu0 %v2579_v0 }
 0x627   :  { %2342 = vmatpush3.msra.mxu0 %v877_v14 }
 0x628   :  { %2343 = vmatprep.subr.mxu0 %v2579_v0 }
 0x629   :  { %2344 = vmatpush3.msra.mxu0 %v876_v16  ;;  %v2946_v16 = vld [vmem:[%s1982_s21 + $0x1] ss:$0 sm:$0xff] }
 0x62a   :  { %2345 = vmatprep.subr.mxu0 %v2579_v0 }
 0x62b   :  { %2346 = vmatpush3.msra.mxu0 %v875_v18 }
 0x62c   :  { %2347 = vmatprep.subr.mxu0 %v2579_v0 }
 0x62d   :  { %2348 = vmatpush3.msra.mxu0 %v874_v20 }
 0x62e   :  { %2349 = vmatprep.subr.mxu0 %v2579_v0 }
 0x62f   :  { %2350 = vmatpush3.msra.mxu0 %v873_v22 }
 0x630   :  { %2351 = vmatprep.subr.mxu0 %v2579_v0 }
 0x631   :  { %2352 = vmatpush3.msra.mxu0 %v872_v24  ;;  %v998_v24 = vld [vmem:[%s1965_s25] sm:$0x3f]  ;;  %s2606_s25 = smov 32  }
 0x632   :  { %2353 = vmatprep.subr.mxu0 %v2579_v0  ;;  %s3033_s28 = sld [smem:[%s3206_s0 + %s2606_s25]]  }
 0x633   :  { %2354 = vmatpush3.msra.mxu0 %v871_v26 }
 0x634   :  { %2355 = vmatprep.subr.mxu0 %v2579_v0 }
 0x635   :  { %2356 = vmatpush3.msra.mxu0 %v870_v28 }
 0x636   :  { %2357 = vmatprep.subr.mxu0 %v2579_v0 }
 0x637   :  { %2358 = vmatpush3.msra.mxu0 %v869_v30 }
 0x638   :  { %2359 = vmatprep.subr.mxu0 %v2579_v0 }
 0x639   :  { %2360 = vmatpush3.msra.mxu0 %v868_v32 }
 0x63a   :  { %2361 = vmatprep.subr.mxu0 %v2579_v0 }
 0x63b   :  { %2362 = vmatpush3.msra.mxu0 %v867_v34 }
 0x63c   :  { %2363 = vmatprep.subr.mxu0 %v2579_v0 }
 0x63d   :  { %2364 = vmatpush3.msra.mxu0 %v866_v47 }
 0x63e   :  { %2365 = vmatprep.subr.mxu0 %v2579_v0 }
 0x63f   :  { %2366 = vmatpush3.msra.mxu0 %v865_v52 }
 0x640   :  { %2367 = vmatprep.subr.mxu0 %v2579_v0 }
 0x641   :  { %2368 = vmatpush3.msra.mxu0 %v864_v58 }
 0x642   :  { %2372 = vmatprep.subr.mxu0 %v2579_v0 }
 0x6e2   :  { %v2832_v4 = vpop.f32.mrf.mxu0 }
 0x6e3   :  { %v748_v5 = vsel %vm419_vm4, %v2832_v4, 0.0  ;;  %v752_v6 = vmul.f32 %v2832_v4, %v2832_v4 }
 0x6e4   :  { %749 = vadd.xlane.f32.xlu0 %v748_v5  ;;  %v2301_v7 = vpop.f32.mrf.mxu0 }
 0x6e5   :  { %v753_v8 = vsel %vm419_vm4, %v752_v6, 0.0 }
 0x6e6   :  { %754 = vadd.xlane.f32.xlu1 %v753_v8 }
 0x76d   :  { %v750_v35 = vpop.xlane.xlu0 %749 }
 0x76e   :  { %v751_v36 = vmul.f32 0.015625, %v750_v35 }
 0x76f   :  { %v755_v37 = vpop.xlane.xlu1 %754 }
 0x770   :  { %v757_v38 = vmul.f32 %v751_v36, %v751_v36  ;;  %v756_v39 = vmul.f32 0.015625, %v755_v37 }
 0x772   :  { %v758_v41 = vsub.f32 %v756_v39, %v757_v38  ;;  %v1086_v38 = vld [vmem:[%s1966_s29] sm:$0x3f]  ;;  %s2607_s29 = smov 23  }
 0x773   :  { %s1978_s2 = sld [smem:[%s3206_s0 + %s2607_s29]]  }
 0x774   :  { %v760_v43 = vadd.f32 1e-05, %v758_v41 }
 0x776   :  { %2566 = vrsqrt.f32 %v760_v43  ;;  %v1090_v43 = vld [vmem:[%s1967_s3] sm:$0x3f]  ;;  %s2608_s3 = smov 24  }
 0x777   :  { %s1979_s6 = sld [smem:[%s3206_s0 + %s2608_s3]]  }
 0x783   :  { %v2567_v49 = vpop.eup %2566 }
 0x784   :  { %v762_v53 = vmul.f32 %v2567_v49, %v759_v44 }
 0x786   :  { %768 = vperm.xlu0 %2560, %v762_v53   ;;  %v764_v55 = vmul.f32 %v762_v53, %v751_v36 }
 0x788   :  { %v765_v60 = vsub.f32 %v763_v54, %v764_v55 }
 0x78a   :  { %774 = vperm.xlu1 %2561, %v765_v60  }
 0x801   :  { %v769_v61 = vpop.permute.xlu0 %768 }
 0x802   :  { %v771_v62 = vmul.f32 %v769_v61, %v2832_v4  ;;  %v2931_v4 = vld [vmem:[%s1982_s21 + $0x2] ss:$0 sm:$0xff]  ;;  %s2605_s21 = smov 22  }
 0x803   :  { %s1977_s24 = sld [smem:[%s3206_s0 + %s2605_s21]]  }
 0x805   :  { %v775_v63 = vpop.permute.xlu1 %774 }
 0x806   :  { %v2920_v1 = vadd.f32 %v775_v63, %v771_v62 }
 0x808   :  { %2335 = vmatmul.mubr.f32.vlgmr.msra.gmra.mxu1 %v2920_v1  ;;  %2370 = vmatmul.mubr.f32.vlgmr.msra.gmra.mxu0 %v2920_v1 }
 0x809   :  { %2380 = vmatprep.mubr.msk.f32.mxu0 %vm2582_vm0, %v2579_v0  ;;  %2410 = vmatprep.mubr.msk.f32.mxu1 %vm2582_vm0, %v2579_v0 }
 0x8c8   :  { %v860_v2 = vpop.f32.mrf.mxu1  ;;  %v946_v3 = vpop.f32.mrf.mxu0 }
 0x8c9   :  { %v950_v5 = vmax.f32 %v860_v2, %v946_v3 }
 0x8ca   :  { %v2336_v6 = vpop.f32.mrf.mxu1  ;;  %v2371_v7 = vpop.f32.mrf.mxu0 }
 0x8cb   :  { %v974_v8 = vmul.f32 %v2931_v4, %v950_v5  ;;  %977 = vrot.lane.b32.xlu1 %v950_v5, %s2584_s13  ;;  %986 = vrot.lane.b32.xlu0 %v950_v5, %s2581_s11 }
 0x8cd   :  { %975 = vst [vmem:[#allocation2 + $0xc] sm:$0x3f] %v974_v8  ;;  %v1152_v8 = vld [vmem:[%s1968_s7] sm:$0x3f]  ;;  %s2609_s7 = smov 19  }
 0x8ce   :  { %s1974_s15 = sld [smem:[%s3206_s0 + %s2609_s7]]  }
 0x8cf   :  { %952 = vrot.lane.b32.xlu1 %v950_v5, %s2580_s10  ;;  %961 = vrot.lane.b32.xlu0 %v950_v5, %s2583_s12 }
 0x93d   :  { %v978_v11 = vpop.permute.xlu1 %977  ;;  %v987_v12 = vpop.permute.xlu0 %986 }
 0x93e   :  { %v983_v13 = vmul.f32 %v2938_v9, %v978_v11  ;;  %v992_v14 = vmul.f32 %v2940_v10, %v987_v12 }
 0x940   :  { %984 = vst [vmem:[#allocation2 + $0x12] sm:$0x3f] %v983_v13  ;;  %993 = vst [vmem:[#allocation2 + $0x18] sm:$0x3f] %v992_v14 }
 0x941   :  { %v953_v17 = vpop.permute.xlu1 %952  ;;  %v962_v18 = vpop.permute.xlu0 %961 }
 0x942   :  { %v958_v19 = vmul.f32 %v2944_v15, %v953_v17  ;;  %v967_v20 = vmul.f32 %v2946_v16, %v962_v18 }
 0x944   :  { %959 = vst [vmem:[#allocation2] sm:$0x3f] %v958_v19  ;;  %968 = vst [vmem:[#allocation2 + $0x6] sm:$0x3f] %v967_v20 }
 0x947   :  { %v997_v21 = vld [vmem:[#allocation2 + $0x18] sm:$0x3f]  ;;  %v996_v22 = vld [vmem:[#allocation2 + $0x10] sm:$0xff] }
 0x948   :  { %2373 = vmatpush3.msk.msra.mxu0 %vm419_vm4, %v997_v21 }
 0x949   :  { %2374 = vmatprep.subr.mxu0 %v2579_v0 }
 0x94a   :  { %2375 = vmatpush3.msra.mxu0 %v996_v22 }
 0x94b   :  { %2376 = vmatprep.subr.mxu0 %v2579_v0  ;;  %v995_v23 = vld [vmem:[#allocation2 + $0x8] sm:$0xff]  ;;  %v994_v25 = vld [vmem:[#allocation2] sm:$0xff] }
 0x94c   :  { %2377 = vmatpush3.msra.mxu0 %v995_v23 }
 0x94d   :  { %2378 = vmatprep.subr.mxu0 %v2579_v0 }
 0x94e   :  { %2379 = vmatpush3.msra.mxu0 %v994_v25  ;;  %v1240_v25 = vld [vmem:[%s1969_s16] sm:$0x3f]  ;;  %s2610_s16 = smov 33  }
 0x94f   :  { %2381 = vmatmul.mubr.msk.f32.vlgmr.msra.gmra.mxu0 %vm671_vm5, %v998_v24  ;;  %2383 = vmatprep.subr.mxu0 %v2579_v0  ;;  %s3127_s19 = sld [smem:[%s3206_s0 + %s2610_s16]]  }
 0x950   :  { %2391 = vmatprep.mubr.msk.f32.mxu0 %vm2582_vm0, %v2579_v0 }
 0xa0f   :  { %v1071_v26 = vpop.f32.mrf.mxu0 }
 0xa10   :  { %v1075_v27 = vsel %vm419_vm4, %v1071_v26, 0.0  ;;  %v1079_v28 = vmul.f32 %v1071_v26, %v1071_v26 }
 0xa11   :  { %1076 = vadd.xlane.f32.xlu0 %v1075_v27  ;;  %v2382_v29 = vpop.f32.mrf.mxu0 }
 0xa12   :  { %v1080_v30 = vsel %vm419_vm4, %v1079_v28, 0.0  ;;  %v1244_v28 = vld [vmem:[%s1970_s20] sm:$0x3f]  ;;  %s2611_s20 = smov 20  }
 0xa13   :  { %1081 = vadd.xlane.f32.xlu1 %v1080_v30  ;;  %s1975_s23 = sld [smem:[%s3206_s0 + %s2611_s20]]  }
 0xa9a   :  { %v1077_v31 = vpop.xlane.xlu0 %1076 }
 0xa9b   :  { %v1078_v32 = vmul.f32 0.03125, %v1077_v31 }
 0xa9c   :  { %v1082_v33 = vpop.xlane.xlu1 %1081 }
 0xa9d   :  { %v1084_v34 = vmul.f32 %v1078_v32, %v1078_v32  ;;  %v1083_v35 = vmul.f32 0.03125, %v1082_v33 }
 0xa9f   :  { %v1085_v36 = vsub.f32 %v1083_v35, %v1084_v34 }
 0xaa1   :  { %v1087_v37 = vadd.f32 1e-05, %v1085_v36 }
 0xaa3   :  { %2568 = vrsqrt.f32 %v1087_v37 }
 0xab0   :  { %v2569_v39 = vpop.eup %2568 }
 0xab1   :  { %v1089_v41 = vmul.f32 %v2569_v39, %v1086_v38 }
 0xab3   :  { %1095 = vperm.xlu0 %2560, %v1089_v41   ;;  %v1091_v44 = vmul.f32 %v1089_v41, %v1078_v32 }
 0xab5   :  { %v1092_v46 = vsub.f32 %v1090_v43, %v1091_v44 }
 0xab7   :  { %1101 = vperm.xlu1 %2561, %v1092_v46   ;;  %v1547_v46 = vmul.f32 %v2802_v45, %v2920_v1 }
 0xb2e   :  { %v1096_v47 = vpop.permute.xlu0 %1095 }
 0xb2f   :  { %v1098_v48 = vmul.f32 %v1096_v47, %v1071_v26 }
 0xb32   :  { %v1102_v49 = vpop.permute.xlu1 %1101 }
 0xb33   :  { %v1104_v52 = vadd.f32 %v1102_v49, %v1098_v48 }
 0xb35   :  { %v1128_v53 = vmul.f32 %v2931_v4, %v1104_v52  ;;  %1131 = vrot.lane.b32.xlu1 %v1104_v52, %s2584_s13  ;;  %1140 = vrot.lane.b32.xlu0 %v1104_v52, %s2581_s11 }
 0xb37   :  { %1129 = vst [vmem:[#allocation2 + $0xc] sm:$0x3f] %v1128_v53  ;;  %1289 = vst [vmem:[#allocation2 + $0x1e] sm:$0x3f] %v1128_v53 }
 0xb39   :  { %1106 = vrot.lane.b32.xlu1 %v1104_v52, %s2580_s10  ;;  %1115 = vrot.lane.b32.xlu0 %v1104_v52, %s2583_s12 }
 0xba7   :  { %v1132_v54 = vpop.permute.xlu1 %1131  ;;  %v1141_v55 = vpop.permute.xlu0 %1140 }
 0xba8   :  { %v1137_v57 = vmul.f32 %v2938_v9, %v1132_v54  ;;  %v1146_v58 = vmul.f32 %v2940_v10, %v1141_v55 }
 0xbaa   :  { %1138 = vst [vmem:[#allocation2 + $0x12] sm:$0x3f] %v1137_v57  ;;  %1147 = vst [vmem:[#allocation2 + $0x18] sm:$0x3f] %v1146_v58 }
 0xbab   :  { %1311 = vst [vmem:[#allocation2 + $0x36] sm:$0x3f] %v1146_v58  ;;  %1300 = vst [vmem:[#allocation2 + $0x2a] sm:$0x3f] %v1137_v57  ;;  %v1107_v60 = vpop.permute.xlu1 %1106  ;;  %v1116_v61 = vpop.permute.xlu0 %1115 }
 0xbac   :  { %v1112_v62 = vmul.f32 %v2944_v15, %v1107_v60  ;;  %v1121_v63 = vmul.f32 %v2946_v16, %v1116_v61  ;;  %v1443_v60 = vld [vmem:[%s3033_s28 + $0x78] sm:$0xff]  ;;  %v1442_v61 = vld [vmem:[%s3033_s28 + $0x70] sm:$0xff] }
 0xbae   :  { %1113 = vst [vmem:[#allocation2] sm:$0x3f] %v1112_v62  ;;  %1122 = vst [vmem:[#allocation2 + $0x6] sm:$0x3f] %v1121_v63 }
 0xbb1   :  { %v1151_v2 = vld [vmem:[#allocation2 + $0x18] sm:$0x3f]  ;;  %v1150_v5 = vld [vmem:[#allocation2 + $0x10] sm:$0xff] }
 0xbb2   :  { %v1319_v3 = vld [vmem:[#allocation2 + $0x38] sm:$0xf]  ;;  %2384 = vmatpush3.msk.msra.mxu0 %vm419_vm4, %v1151_v2  ;;  %1280 = vst [vmem:[#allocation2 + $0x12] sm:$0x3f] %v1121_v63  ;;  %v1440_v63 = vld [vmem:[%s3033_s28 + $0x60] sm:$0xff] }
 0xbb3   :  { %2395 = vmatpush3.msk.msra.mxu1 %vm194_vm1, %v1319_v3  ;;  %2385 = vmatprep.subr.mxu0 %v2579_v0  ;;  %v1439_v2 = vld [vmem:[%s3033_s28 + $0x58] sm:$0xff]  ;;  %v1438_v3 = vld [vmem:[%s3033_s28 + $0x50] sm:$0xff] }
 0xbb4   :  { %2396 = vmatprep.subr.mxu1 %v2579_v0  ;;  %2386 = vmatpush3.msra.mxu0 %v1150_v5  ;;  %v1437_v5 = vld [vmem:[%s3033_s28 + $0x48] sm:$0xff] }
 0xbb5   :  { %2387 = vmatprep.subr.mxu0 %v2579_v0  ;;  %v1149_v6 = vld [vmem:[#allocation2 + $0x8] sm:$0xff]  ;;  %v1148_v7 = vld [vmem:[#allocation2] sm:$0xff] }
 0xbb6   :  { %2388 = vmatpush3.msra.mxu0 %v1149_v6  ;;  %1269 = vst [vmem:[#allocation2 + $0x6] sm:$0x3f] %v1112_v62  ;;  %v1441_v62 = vld [vmem:[%s3033_s28 + $0x68] sm:$0xff]  ;;  %v1436_v6 = vld [vmem:[%s3033_s28 + $0x40] sm:$0xff] }
 0xbb7   :  { %2389 = vmatprep.subr.mxu0 %v2579_v0 }
 0xbb8   :  { %2390 = vmatpush3.msra.mxu0 %v1148_v7  ;;  %v1435_v7 = vld [vmem:[%s3033_s28 + $0x38] sm:$0xff] }
 0xbb9   :  { %2392 = vmatmul.mubr.msk.f32.vlgmr.msra.gmra.mxu0 %vm671_vm5, %v1152_v8  ;;  %2413 = vmatprep.subr.mxu0 %v2579_v0  ;;  %v1434_v8 = vld [vmem:[%s3033_s28 + $0x30] sm:$0xff] }
 0xbba   :  { %2445 = vmatprep.mubr.msk.f32.mxu0 %vm2582_vm0, %v2579_v0  ;;  %2414 = vmatpush3.msra.mxu0 %v1443_v60  ;;  %v1583_v60 = vld [vmem:[%s1974_s15] sm:$0x3f] }
 0xbbb   :  { %2415 = vmatprep.subr.mxu0 %v2579_v0 }
 0xbbc   :  { %2416 = vmatpush3.msra.mxu0 %v1442_v61 }
 0xbbd   :  { %2417 = vmatprep.subr.mxu0 %v2579_v0 }
 0xbbe   :  { %2418 = vmatpush3.msra.mxu0 %v1441_v62 }
 0xbbf   :  { %2419 = vmatprep.subr.mxu0 %v2579_v0 }
 0xbc0   :  { %2420 = vmatpush3.msra.mxu0 %v1440_v63 }
 0xbc1   :  { %2421 = vmatprep.subr.mxu0 %v2579_v0 }
 0xbc2   :  { %2422 = vmatpush3.msra.mxu0 %v1439_v2 }
 0xbc3   :  { %2423 = vmatprep.subr.mxu0 %v2579_v0 }
 0xbc4   :  { %2424 = vmatpush3.msra.mxu0 %v1438_v3 }
 0xbc5   :  { %2425 = vmatprep.subr.mxu0 %v2579_v0 }
 0xbc6   :  { %2426 = vmatpush3.msra.mxu0 %v1437_v5 }
 0xbc7   :  { %2427 = vmatprep.subr.mxu0 %v2579_v0 }
 0xbc8   :  { %2428 = vmatpush3.msra.mxu0 %v1436_v6  ;;  %v1705_v6 = vld [vmem:[%s3127_s19 + $0x78] sm:$0xff] }
 0xbc9   :  { %2429 = vmatprep.subr.mxu0 %v2579_v0 }
 0xbca   :  { %2430 = vmatpush3.msra.mxu0 %v1435_v7  ;;  %v1704_v7 = vld [vmem:[%s3127_s19 + $0x70] sm:$0xff] }
 0xbcb   :  { %2431 = vmatprep.subr.mxu0 %v2579_v0 }
 0xbcc   :  { %2432 = vmatpush3.msra.mxu0 %v1434_v8  ;;  %v1703_v8 = vld [vmem:[%s3127_s19 + $0x68] sm:$0xff] }
 0xbcd   :  { %2433 = vmatprep.subr.mxu0 %v2579_v0 }
 0xc79   :  { %v1225_v11 = vpop.f32.mrf.mxu0 }
 0xc7a   :  { %v1229_v12 = vsel %vm419_vm4, %v1225_v11, 0.0  ;;  %v1233_v13 = vmul.f32 %v1225_v11, %v1225_v11 }
 0xc7b   :  { %1230 = vadd.xlane.f32.xlu0 %v1229_v12  ;;  %v2393_v14 = vpop.f32.mrf.mxu0  ;;  %v1432_v12 = vld [vmem:[%s3033_s28 + $0x20] sm:$0xff] }
 0xc7c   :  { %v1234_v17 = vsel %vm419_vm4, %v1233_v13, 0.0  ;;  %v1431_v13 = vld [vmem:[%s3033_s28 + $0x18] sm:$0xff] }
 0xc7d   :  { %1235 = vadd.xlane.f32.xlu1 %v1234_v17 }
 0xd04   :  { %v1231_v18 = vpop.xlane.xlu0 %1230 }
 0xd05   :  { %v1232_v19 = vmul.f32 0.03125, %v1231_v18 }
 0xd06   :  { %v1236_v20 = vpop.xlane.xlu1 %1235 }
 0xd07   :  { %v1238_v21 = vmul.f32 %v1232_v19, %v1232_v19  ;;  %v1237_v22 = vmul.f32 0.03125, %v1236_v20 }
 0xd09   :  { %v1239_v23 = vsub.f32 %v1237_v22, %v1238_v21 }
 0xd0b   :  { %v1241_v24 = vadd.f32 1e-05, %v1239_v23  ;;  %v1409_v23 = vld [vmem:[%s1978_s2] sm:$0x3f] }
 0xd0d   :  { %2570 = vrsqrt.f32 %v1241_v24  ;;  %v1430_v24 = vld [vmem:[%s3033_s28 + $0x10] sm:$0xff] }
 0xd1a   :  { %v2571_v26 = vpop.eup %2570 }
 0xd1b   :  { %v1243_v27 = vmul.f32 %v2571_v26, %v1240_v25  ;;  %v1429_v25 = vld [vmem:[%s3033_s28 + $0x8] sm:$0xff] }
 0xd1d   :  { %1249 = vperm.xlu0 %2560, %v1243_v27   ;;  %v1245_v29 = vmul.f32 %v1243_v27, %v1232_v19 }
 0xd1f   :  { %v1246_v30 = vsub.f32 %v1244_v28, %v1245_v29  ;;  %v1413_v28 = vld [vmem:[%s1979_s6] sm:$0x3f] }
 0xd21   :  { %1255 = vperm.xlu1 %2561, %v1246_v30   ;;  %v1428_v30 = vld [vmem:[%s3033_s28] sm:$0xff] }
 0xd98   :  { %v1250_v31 = vpop.permute.xlu0 %1249 }
 0xd99   :  { %v1252_v32 = vmul.f32 %v1250_v31, %v1225_v11  ;;  %v1433_v11 = vld [vmem:[%s3033_s28 + $0x28] sm:$0xff] }
 0xd9a   :  { %2434 = vmatpush3.msra.mxu0 %v1433_v11  ;;  %v1702_v11 = vld [vmem:[%s3127_s19 + $0x60] sm:$0xff] }
 0xd9b   :  { %2435 = vmatprep.subr.mxu0 %v2579_v0 }
 0xd9c   :  { %v1256_v33 = vpop.permute.xlu1 %1255  ;;  %2436 = vmatpush3.msra.mxu0 %v1432_v12  ;;  %v1701_v12 = vld [vmem:[%s3127_s19 + $0x58] sm:$0xff] }
 0xd9d   :  { %v1258_v34 = vadd.f32 %v1256_v33, %v1252_v32  ;;  %2437 = vmatprep.subr.mxu0 %v2579_v0 }
 0xd9e   :  { %2438 = vmatpush3.msra.mxu0 %v1431_v13  ;;  %v1700_v13 = vld [vmem:[%s3127_s19 + $0x50] sm:$0xff] }
 0xd9f   :  { %v1286_v35 = vmul.f32 %v2931_v4, %v1258_v34  ;;  %1291 = vrot.lane.b32.xlu1 %v1258_v34, %s2584_s13  ;;  %1302 = vrot.lane.b32.xlu0 %v1258_v34, %s2581_s11 }
 0xda0   :  { %2439 = vmatprep.subr.mxu0 %v2579_v0 }
 0xda1   :  { %1287 = vst [vmem:[#allocation2 + $0x18] sm:$0x3f] %v1286_v35  ;;  %2440 = vmatpush3.msra.mxu0 %v1430_v24 }
 0xda2   :  { %2441 = vmatprep.subr.mxu0 %v2579_v0 }
 0xda3   :  { %1260 = vrot.lane.b32.xlu1 %v1258_v34, %s2580_s10  ;;  %1271 = vrot.lane.b32.xlu0 %v1258_v34, %s2583_s12 }
 0xda4   :  { %2442 = vmatpush3.msra.mxu0 %v1429_v25 }
 0xda5   :  { %2443 = vmatprep.subr.mxu0 %v2579_v0 }
 0xda6   :  { %2444 = vmatpush3.msra.mxu0 %v1428_v30  ;;  %v1671_v30 = vld [vmem:[%s1975_s23] sm:$0x3f] }
 0xda7   :  { %2502 = vmatprep.subr.mxu0 %v2579_v0 }
 0xda8   :  { %v1315_v49 = vld [vmem:[#allocation2 + $0x18] sm:$0xff] }
 0xe11   :  { %v1292_v36 = vpop.permute.xlu1 %1291  ;;  %v1303_v37 = vpop.permute.xlu0 %1302 }
 0xe12   :  { %v1297_v38 = vmul.f32 %v2938_v9, %v1292_v36  ;;  %v1308_v39 = vmul.f32 %v2940_v10, %v1303_v37 }
 0xe14   :  { %1298 = vst [vmem:[#allocation2 + $0x24] sm:$0x3f] %v1297_v38  ;;  %1309 = vst [vmem:[#allocation2 + $0x30] sm:$0x3f] %v1308_v39 }
 0xe15   :  { %v1261_v41 = vpop.permute.xlu1 %1260  ;;  %v1272_v43 = vpop.permute.xlu0 %1271 }
 0xe16   :  { %v1266_v4 = vmul.f32 %v2944_v15, %v1261_v41  ;;  %v1277_v44 = vmul.f32 %v2946_v16, %v1272_v43  ;;  %v1320_v16 = vld [vmem:[%s1977_s24] sm:$0x3f]  ;;  %s2612_s24 = smov 21  }
 0xe17   :  { %s1976_s27 = sld [smem:[%s3206_s0 + %s2612_s24]]  }
 0xe18   :  { %1267 = vst [vmem:[#allocation2] sm:$0x3f] %v1266_v4  ;;  %1278 = vst [vmem:[#allocation2 + $0xc] sm:$0x3f] %v1277_v44 }
 0xe1b   :  { %v1318_v47 = vld [vmem:[#allocation2 + $0x30] sm:$0xff]  ;;  %v1316_v48 = vld [vmem:[#allocation2 + $0x20] sm:$0xff]  ;;  %v1317_v9 = vld [vmem:[#allocation2 + $0x28] sm:$0xff] }
 0xe1c   :  { %2397 = vmatpush3.msra.mxu1 %v1318_v47  ;;  %1548 = vst [vmem:[#allocation2 + $0x1e] sm:$0x3f] %v1547_v46 }
 0xe1d   :  { %2398 = vmatprep.subr.mxu1 %v2579_v0 }
 0xe1e   :  { %2399 = vmatpush3.msra.mxu1 %v1317_v9 }
 0xe1f   :  { %2400 = vmatprep.subr.mxu1 %v2579_v0  ;;  %v1314_v10 = vld [vmem:[#allocation2 + $0x10] sm:$0xff]  ;;  %v1313_v15 = vld [vmem:[#allocation2 + $0x8] sm:$0xff]  ;;  %v1312_v52 = vld [vmem:[#allocation2] sm:$0xff] }
 0xe20   :  { %2401 = vmatpush3.msra.mxu1 %v1316_v48 }
 0xe21   :  { %2402 = vmatprep.subr.mxu1 %v2579_v0 }
 0xe22   :  { %2403 = vmatpush3.msra.mxu1 %v1315_v49 }
 0xe23   :  { %2404 = vmatprep.subr.mxu1 %v2579_v0 }
 0xe24   :  { %2405 = vmatpush3.msra.mxu1 %v1314_v10  ;;  %v3097_v10 = vld [vmem:[%s2628_s9 + $0x2] ss:$0 sm:$0xff] }
 0xe25   :  { %2406 = vmatprep.subr.mxu1 %v2579_v0 }
 0xe26   :  { %2407 = vmatpush3.msra.mxu1 %v1313_v15 }
 0xe27   :  { %2408 = vmatprep.subr.mxu1 %v2579_v0 }
 0xe28   :  { %2409 = vmatpush3.msra.mxu1 %v1312_v52 }
 0xe29   :  { %2411 = vmatmul.mubr.msk.f32.vlgmr.msra.gmra.mxu1 %vm1321_vm6, %v1320_v16  ;;  %2448 = vmatprep.subr.mxu1 %v2579_v0 }
 0xe2a   :  { %2464 = vmatprep.mubr.msk.f32.mxu1 %vm2582_vm0, %v2579_v0 }
 0xee9   :  { %v3023_v53 = vpop.f32.mrf.mxu1 }
 0xeea   :  { %v1398_v54 = vsel %vm419_vm4, %v3023_v53, 0.0  ;;  %v1402_v55 = vmul.f32 %v3023_v53, %v3023_v53 }
 0xeeb   :  { %1399 = vadd.xlane.f32.xlu0 %v1398_v54  ;;  %v2412_v57 = vpop.f32.mrf.mxu1 }
 0xeec   :  { %v1403_v58 = vsel %vm419_vm4, %v1402_v55, 0.0 }
 0xeed   :  { %1404 = vadd.xlane.f32.xlu1 %v1403_v58 }
 0xf74   :  { %v1400_v14 = vpop.xlane.xlu0 %1399 }
 0xf75   :  { %v1401_v17 = vmul.f32 0.03125, %v1400_v14  ;;  %v1699_v14 = vld [vmem:[%s3127_s19 + $0x48] sm:$0xff] }
 0xf76   :  { %v1405_v18 = vpop.xlane.xlu1 %1404 }
 0xf77   :  { %v1407_v19 = vmul.f32 %v1401_v17, %v1401_v17  ;;  %v1406_v20 = vmul.f32 0.03125, %v1405_v18  ;;  %v1697_v18 = vld [vmem:[%s3127_s19 + $0x38] sm:$0xff] }
 0xf79   :  { %v1408_v21 = vsub.f32 %v1406_v20, %v1407_v19  ;;  %v1696_v19 = vld [vmem:[%s3127_s19 + $0x30] sm:$0xff]  ;;  %v1695_v20 = vld [vmem:[%s3127_s19 + $0x28] sm:$0xff] }
 0xf7b   :  { %v1410_v22 = vadd.f32 1e-05, %v1408_v21  ;;  %v1694_v21 = vld [vmem:[%s3127_s19 + $0x20] sm:$0xff] }
 0xf7d   :  { %2572 = vrsqrt.f32 %v1410_v22  ;;  %v1693_v22 = vld [vmem:[%s3127_s19 + $0x18] sm:$0xff] }
 0xf8a   :  { %v2573_v26 = vpop.eup %2572 }
 0xf8b   :  { %v1412_v27 = vmul.f32 %v2573_v26, %v1409_v23 }
 0xf8d   :  { %1418 = vperm.xlu0 %2560, %v1412_v27   ;;  %v1414_v29 = vmul.f32 %v1412_v27, %v1401_v17  ;;  %v1698_v17 = vld [vmem:[%s3127_s19 + $0x40] sm:$0xff] }
 0xf8f   :  { %v1415_v31 = vsub.f32 %v1413_v28, %v1414_v29 }
 0xf91   :  { %1571 = vrot.lane.b32.xlu0 %v2920_v1, %s2581_s11  ;;  %1424 = vperm.xlu1 %2561, %v1415_v31   ;;  %v1692_v31 = vld [vmem:[%s3127_s19 + $0x10] sm:$0xff] }
0x1008   :  { %v1419_v32 = vpop.permute.xlu0 %1418 }
0x1009   :  { %v1421_v33 = vmul.f32 %v1419_v32, %v3023_v53  ;;  %v1691_v32 = vld [vmem:[%s3127_s19 + $0x8] sm:$0xff] }
0x100c   :  { %v1572_v34 = vpop.permute.xlu0 %1571  ;;  %v1425_v35 = vpop.permute.xlu1 %1424 }
0x100d   :  { %v1573_v36 = vmul.f32 %v2811_v51, %v1572_v34  ;;  %v1427_v37 = vadd.f32 %v1425_v35, %v1421_v33  ;;  %v1675_v35 = vld [vmem:[%s1976_s27] sm:$0x3f] }
0x100f   :  { %1574 = vst [vmem:[#allocation2 + $0x36] sm:$0x3f] %v1573_v36  ;;  %2446 = vmatmul.mubr.f32.vlgmr.msra.gmra.mxu0 %v1427_v37  ;;  %v1690_v37 = vld [vmem:[%s3127_s19] sm:$0xff] }
0x1010   :  { %2518 = vmatprep.mubr.msk.f32.mxu0 %vm2582_vm0, %v2579_v0 }
0x1016   :  { %v1582_v38 = vld [vmem:[#allocation2 + $0x38] sm:$0xf] }
0x1017   :  { %2449 = vmatpush3.msk.msra.mxu1 %vm194_vm1, %v1582_v38 }
0x1018   :  { %2450 = vmatprep.subr.mxu1 %v2579_v0 }
0x10cf   :  { %v1510_v39 = vpop.f32.mrf.mxu0 }
0x10d0   :  { %v1545_v41 = vmul.f32 %v2802_v45, %v1510_v39  ;;  %1550 = vrot.lane.b32.xlu0 %v1510_v39, %s2584_s13  ;;  %1563 = vrot.lane.b32.xlu1 %v1510_v39, %s2581_s11 }
0x10d1   :  { %v2447_v43 = vpop.f32.mrf.mxu0 }
0x10d2   :  { %1546 = vst [vmem:[#allocation2 + $0x18] sm:$0x3f] %v1545_v41  ;;  %v2042_v41 = vld [vmem:[%s2628_s9 + $0x4] ss:$0 sm:$0xff] }
0x10d4   :  { %1528 = vrot.lane.b32.xlu0 %v1510_v39, %s2583_s12  ;;  %1558 = vrot.lane.b32.xlu1 %v2920_v1, %s2584_s13 }
0x10d8   :  { %1523 = vrot.lane.b32.xlu0 %v2920_v1, %s2580_s10  ;;  %1536 = vrot.lane.b32.xlu1 %v2920_v1, %s2583_s12 }
0x10d9   :  { %v1578_v55 = vld [vmem:[#allocation2 + $0x18] sm:$0xff] }
0x10dc   :  { %1515 = vrot.lane.b32.xlu1 %v1510_v39, %s2580_s10 }
0x1142   :  { %v1551_v45 = vpop.permute.xlu0 %1550  ;;  %v1564_v4 = vpop.permute.xlu1 %1563 }
0x1143   :  { %v1556_v44 = vmul.f32 %v2815_v56, %v1551_v45  ;;  %v1569_v46 = vmul.f32 %v2811_v51, %v1564_v4  ;;  %v1809_v51 = vmul.f32 %v3097_v10, %v2791_v42 }
0x1145   :  { %1557 = vst [vmem:[#allocation2 + $0x24] sm:$0x3f] %v1556_v44  ;;  %1570 = vst [vmem:[#allocation2 + $0x30] sm:$0x3f] %v1569_v46 }
0x1146   :  { %v1529_v47 = vpop.permute.xlu0 %1528  ;;  %v1559_v48 = vpop.permute.xlu1 %1558 }
0x1147   :  { %v1534_v49 = vmul.f32 %v2809_v50, %v1529_v47  ;;  %v1560_v9 = vmul.f32 %v2815_v56, %v1559_v48 }
0x1149   :  { %1535 = vst [vmem:[#allocation2 + $0xc] sm:$0x3f] %v1534_v49  ;;  %1561 = vst [vmem:[#allocation2 + $0x2a] sm:$0x3f] %v1560_v9 }
0x114a   :  { %v1524_v1 = vpop.permute.xlu0 %1523  ;;  %v1537_v15 = vpop.permute.xlu1 %1536 }
0x114b   :  { %v1525_v16 = vmul.f32 %v2818_v59, %v1524_v1  ;;  %v1538_v52 = vmul.f32 %v2809_v50, %v1537_v15 }
0x114c   :  { %v1581_v53 = vld [vmem:[#allocation2 + $0x30] sm:$0xff]  ;;  %v1579_v54 = vld [vmem:[#allocation2 + $0x20] sm:$0xff] }
0x114d   :  { %1526 = vst [vmem:[#allocation2 + $0x6] sm:$0x3f] %v1525_v16  ;;  %1539 = vst [vmem:[#allocation2 + $0x12] sm:$0x3f] %v1538_v52  ;;  %2451 = vmatpush3.msra.mxu1 %v1581_v53 }
0x114e   :  { %1810 = vst [vmem:[#allocation2 + $0x1e] sm:$0x3f] %v1809_v51  ;;  %v1516_v56 = vpop.permute.xlu1 %1515  ;;  %2452 = vmatprep.subr.mxu1 %v2579_v0  ;;  %v2039_v51 = vld [vmem:[%s2628_s9 + $0x1] ss:$0 sm:$0xff] }
0x114f   :  { %v1521_v57 = vmul.f32 %v2818_v59, %v1516_v56 }
0x1150   :  { %v1580_v58 = vld [vmem:[#allocation2 + $0x28] sm:$0xff] }
0x1151   :  { %1522 = vst [vmem:[#allocation2] sm:$0x3f] %v1521_v57  ;;  %2453 = vmatpush3.msra.mxu1 %v1580_v58  ;;  %v2038_v57 = vld [vmem:[%s2628_s9] ss:$0 sm:$0xff] }
0x1152   :  { %2454 = vmatprep.subr.mxu1 %v2579_v0 }
0x1153   :  { %2455 = vmatpush3.msra.mxu1 %v1579_v54 }
0x1154   :  { %2456 = vmatprep.subr.mxu1 %v2579_v0  ;;  %v1577_v50 = vld [vmem:[#allocation2 + $0x10] sm:$0xff]  ;;  %v1576_v59 = vld [vmem:[#allocation2 + $0x8] sm:$0xff] }
0x1155   :  { %2457 = vmatpush3.msra.mxu1 %v1578_v55 }
0x1156   :  { %2458 = vmatprep.subr.mxu1 %v2579_v0 }
0x1157   :  { %2459 = vmatpush3.msra.mxu1 %v1577_v50 }
0x1158   :  { %2460 = vmatprep.subr.mxu1 %v2579_v0  ;;  %v1575_v61 = vld [vmem:[#allocation2] sm:$0xff] }
0x1159   :  { %2461 = vmatpush3.msra.mxu1 %v1576_v59 }
0x115a   :  { %2462 = vmatprep.subr.mxu1 %v2579_v0 }
0x115b   :  { %2463 = vmatpush3.msra.mxu1 %v1575_v61 }
0x115c   :  { %2465 = vmatmul.mubr.msk.f32.vlgmr.msra.gmra.mxu1 %vm1321_vm6, %v1583_v60  ;;  %2467 = vmatprep.subr.mxu1 %v2579_v0 }
0x115d   :  { %2499 = vmatprep.mubr.msk.f32.mxu1 %vm2582_vm0, %v2579_v0  ;;  %2468 = vmatpush3.msra.mxu1 %v1705_v6 }
0x115e   :  { %2469 = vmatprep.subr.mxu1 %v2579_v0 }
0x115f   :  { %2470 = vmatpush3.msra.mxu1 %v1704_v7 }
0x1160   :  { %2471 = vmatprep.subr.mxu1 %v2579_v0 }
0x1161   :  { %2472 = vmatpush3.msra.mxu1 %v1703_v8 }
0x1162   :  { %2473 = vmatprep.subr.mxu1 %v2579_v0 }
0x1163   :  { %2474 = vmatpush3.msra.mxu1 %v1702_v11 }
0x1164   :  { %2475 = vmatprep.subr.mxu1 %v2579_v0 }
0x1165   :  { %2476 = vmatpush3.msra.mxu1 %v1701_v12 }
0x1166   :  { %2477 = vmatprep.subr.mxu1 %v2579_v0 }
0x1167   :  { %2478 = vmatpush3.msra.mxu1 %v1700_v13 }
0x1168   :  { %2479 = vmatprep.subr.mxu1 %v2579_v0 }
0x1169   :  { %2480 = vmatpush3.msra.mxu1 %v1699_v14 }
0x116a   :  { %2481 = vmatprep.subr.mxu1 %v2579_v0 }
0x116b   :  { %2482 = vmatpush3.msra.mxu1 %v1698_v17 }
0x116c   :  { %2483 = vmatprep.subr.mxu1 %v2579_v0 }
0x116d   :  { %2484 = vmatpush3.msra.mxu1 %v1697_v18 }
0x116e   :  { %2485 = vmatprep.subr.mxu1 %v2579_v0 }
0x116f   :  { %2486 = vmatpush3.msra.mxu1 %v1696_v19 }
0x1170   :  { %2487 = vmatprep.subr.mxu1 %v2579_v0 }
0x1171   :  { %2488 = vmatpush3.msra.mxu1 %v1695_v20 }
0x1172   :  { %2489 = vmatprep.subr.mxu1 %v2579_v0 }
0x1173   :  { %2490 = vmatpush3.msra.mxu1 %v1694_v21 }
0x1174   :  { %2491 = vmatprep.subr.mxu1 %v2579_v0 }
0x1175   :  { %2492 = vmatpush3.msra.mxu1 %v1693_v22 }
0x1176   :  { %2493 = vmatprep.subr.mxu1 %v2579_v0 }
0x1177   :  { %2494 = vmatpush3.msra.mxu1 %v1692_v31 }
0x1178   :  { %2495 = vmatprep.subr.mxu1 %v2579_v0 }
0x1179   :  { %2496 = vmatpush3.msra.mxu1 %v1691_v32 }
0x117a   :  { %2497 = vmatprep.subr.mxu1 %v2579_v0 }
0x117b   :  { %2498 = vmatpush3.msra.mxu1 %v1690_v37 }
0x121c   :  { %v3117_v62 = vpop.f32.mrf.mxu1 }
0x121d   :  { %v1660_v63 = vsel %vm419_vm4, %v3117_v62, 0.0  ;;  %v1664_v2 = vmul.f32 %v3117_v62, %v3117_v62 }
0x121e   :  { %1661 = vadd.xlane.f32.xlu0 %v1660_v63  ;;  %v2466_v3 = vpop.f32.mrf.mxu1 }
0x121f   :  { %v1665_v5 = vsel %vm419_vm4, %v1664_v2, 0.0 }
0x1220   :  { %1666 = vadd.xlane.f32.xlu1 %v1665_v5 }
0x12a7   :  { %v1662_v23 = vpop.xlane.xlu0 %1661 }
0x12a8   :  { %v1663_v24 = vmul.f32 0.015625, %v1662_v23 }
0x12a9   :  { %v1667_v25 = vpop.xlane.xlu1 %1666 }
0x12aa   :  { %v1669_v26 = vmul.f32 %v1663_v24, %v1663_v24  ;;  %v1668_v27 = vmul.f32 0.015625, %v1667_v25  ;;  %v1935_v25 = vld [vmem:[%s1973_s4] sm:$0xff] }
0x12ac   :  { %v1670_v28 = vsub.f32 %v1668_v27, %v1669_v26 }
0x12ae   :  { %v1672_v29 = vadd.f32 1e-05, %v1670_v28 }
0x12b0   :  { %2574 = vrsqrt.f32 %v1672_v29 }
0x12bd   :  { %v2575_v33 = vpop.eup %2574 }
0x12be   :  { %v1674_v34 = vmul.f32 %v2575_v33, %v1671_v30 }
0x12c0   :  { %1680 = vperm.xlu0 %2560, %v1674_v34   ;;  %v1676_v36 = vmul.f32 %v1674_v34, %v1663_v24 }
0x12c2   :  { %v1677_v38 = vsub.f32 %v1675_v35, %v1676_v36 }
0x12c4   :  { %1833 = vrot.lane.b32.xlu0 %v2791_v42, %s2581_s11  ;;  %1686 = vperm.xlu1 %2561, %v1677_v38  }
0x133b   :  { %v1681_v39 = vpop.permute.xlu0 %1680 }
0x133c   :  { %v1683_v43 = vmul.f32 %v1681_v39, %v3117_v62 }
0x133f   :  { %v1834_v45 = vpop.permute.xlu0 %1833  ;;  %v1687_v4 = vpop.permute.xlu1 %1686 }
0x1340   :  { %v1835_v44 = vmul.f32 %v2042_v41, %v1834_v45  ;;  %v1689_v46 = vadd.f32 %v1687_v4, %v1683_v43 }
0x1342   :  { %1836 = vst [vmem:[#allocation2 + $0x36] sm:$0x3f] %v1835_v44  ;;  %2500 = vmatmul.mubr.f32.vlgmr.msra.gmra.mxu1 %v1689_v46 }
0x1349   :  { %v1844_v47 = vld [vmem:[#allocation2 + $0x38] sm:$0xf] }
0x134a   :  { %2503 = vmatpush3.msk.msra.mxu0 %vm194_vm1, %v1844_v47 }
0x134b   :  { %2504 = vmatprep.subr.mxu0 %v2579_v0 }
0x1402   :  { %v1772_v48 = vpop.f32.mrf.mxu1 }
0x1403   :  { %v1807_v49 = vmul.f32 %v3097_v10, %v1772_v48  ;;  %1812 = vrot.lane.b32.xlu0 %v1772_v48, %s2584_s13  ;;  %1825 = vrot.lane.b32.xlu1 %v1772_v48, %s2581_s11  ;;  %v2041_v10 = vld [vmem:[%s2628_s9 + $0x3] ss:$0 sm:$0xff] }
0x1404   :  { %v2501_v9 = vpop.f32.mrf.mxu1 }
0x1405   :  { %1808 = vst [vmem:[#allocation2 + $0x18] sm:$0x3f] %v1807_v49 }
0x1407   :  { %1790 = vrot.lane.b32.xlu0 %v1772_v48, %s2583_s12  ;;  %1820 = vrot.lane.b32.xlu1 %v2791_v42, %s2584_s13  ;;  %s2614_s13 = smov 17  }
0x1408   :  { %s1972_s30 = sld [smem:[%s3206_s0 + %s2614_s13]]  }
0x140b   :  { %1785 = vrot.lane.b32.xlu0 %v2791_v42, %s2580_s10  ;;  %1798 = vrot.lane.b32.xlu1 %v2791_v42, %s2583_s12 }
0x140c   :  { %v1840_v3 = vld [vmem:[#allocation2 + $0x18] sm:$0xff] }
0x140f   :  { %1777 = vrot.lane.b32.xlu1 %v1772_v48, %s2580_s10  ;;  %s2613_s10 = smov 16  }
0x1410   :  { %s1971_s12 = sld [smem:[%s3206_s0 + %s2613_s10]]  }
0x1416   :  { %v1845_v7 = vld [vmem:[%s1971_s12] sm:$0xff] }
0x1475   :  { %v1813_v1 = vpop.permute.xlu0 %1812  ;;  %v1826_v15 = vpop.permute.xlu1 %1825 }
0x1476   :  { %v1818_v16 = vmul.f32 %v2041_v10, %v1813_v1  ;;  %v1831_v52 = vmul.f32 %v2042_v41, %v1826_v15 }
0x1478   :  { %1819 = vst [vmem:[#allocation2 + $0x24] sm:$0x3f] %v1818_v16  ;;  %1832 = vst [vmem:[#allocation2 + $0x30] sm:$0x3f] %v1831_v52 }
0x1479   :  { %v1791_v53 = vpop.permute.xlu0 %1790  ;;  %v1821_v54 = vpop.permute.xlu1 %1820 }
0x147a   :  { %v1796_v55 = vmul.f32 %v2039_v51, %v1791_v53  ;;  %v1822_v56 = vmul.f32 %v2041_v10, %v1821_v54 }
0x147c   :  { %1797 = vst [vmem:[#allocation2 + $0xc] sm:$0x3f] %v1796_v55  ;;  %1823 = vst [vmem:[#allocation2 + $0x2a] sm:$0x3f] %v1822_v56 }
0x147d   :  { %v1786_v58 = vpop.permute.xlu0 %1785  ;;  %v1799_v50 = vpop.permute.xlu1 %1798 }
0x147e   :  { %v1787_v42 = vmul.f32 %v2038_v57, %v1786_v58  ;;  %v1800_v59 = vmul.f32 %v2039_v51, %v1799_v50 }
0x147f   :  { %v1843_v60 = vld [vmem:[#allocation2 + $0x30] sm:$0xff]  ;;  %v1841_v2 = vld [vmem:[#allocation2 + $0x20] sm:$0xff] }
0x1480   :  { %1788 = vst [vmem:[#allocation2 + $0x6] sm:$0x3f] %v1787_v42  ;;  %1801 = vst [vmem:[#allocation2 + $0x12] sm:$0x3f] %v1800_v59  ;;  %2505 = vmatpush3.msra.mxu0 %v1843_v60 }
0x1481   :  { %v1778_v61 = vpop.permute.xlu1 %1777  ;;  %2506 = vmatprep.subr.mxu0 %v2579_v0 }
0x1482   :  { %v1783_v62 = vmul.f32 %v2038_v57, %v1778_v61 }
0x1483   :  { %v1842_v63 = vld [vmem:[#allocation2 + $0x28] sm:$0xff] }
0x1484   :  { %1784 = vst [vmem:[#allocation2] sm:$0x3f] %v1783_v62  ;;  %2507 = vmatpush3.msra.mxu0 %v1842_v63 }
0x1485   :  { %2508 = vmatprep.subr.mxu0 %v2579_v0 }
0x1486   :  { %2509 = vmatpush3.msra.mxu0 %v1841_v2 }
0x1487   :  { %2510 = vmatprep.subr.mxu0 %v2579_v0  ;;  %v1839_v5 = vld [vmem:[#allocation2 + $0x10] sm:$0xff]  ;;  %v1838_v6 = vld [vmem:[#allocation2 + $0x8] sm:$0xff] }
0x1488   :  { %2511 = vmatpush3.msra.mxu0 %v1840_v3 }
0x1489   :  { %2512 = vmatprep.subr.mxu0 %v2579_v0 }
0x148a   :  { %2513 = vmatpush3.msra.mxu0 %v1839_v5 }
0x148b   :  { %2514 = vmatprep.subr.mxu0 %v2579_v0  ;;  %v1837_v8 = vld [vmem:[#allocation2] sm:$0xff] }
0x148c   :  { %2515 = vmatpush3.msra.mxu0 %v1838_v6 }
0x148d   :  { %2516 = vmatprep.subr.mxu0 %v2579_v0  ;;  %v1931_v0 = vld [vmem:[%s1972_s30] sm:$0xff] }
0x148e   :  { %2517 = vmatpush3.msra.mxu0 %v1837_v8 }
0x148f   :  { %2519 = vmatmul.mubr.msk.f32.vlgmr.msra.gmra.mxu0 %vm1321_vm6, %v1845_v7 }
0x154f   :  { %v1918_v11 = vpop.f32.mrf.mxu0 }
0x1550   :  { %1922 = vadd.xlane.f32.xlu0 %v1918_v11  ;;  %v1925_v12 = vmul.f32 %v1918_v11, %v1918_v11 }
0x1551   :  { %v2520_v13 = vpop.f32.mrf.mxu0 }
0x1552   :  { %1926 = vadd.xlane.f32.xlu1 %v1925_v12 }
0x15d9   :  { %v1923_v14 = vpop.xlane.xlu0 %1922 }
0x15da   :  { %v1924_v17 = vmul.f32 0.0078125, %v1923_v14 }
0x15db   :  { %v1927_v18 = vpop.xlane.xlu1 %1926 }
0x15dc   :  { %v1929_v19 = vmul.f32 %v1924_v17, %v1924_v17  ;;  %v1928_v20 = vmul.f32 0.0078125, %v1927_v18 }
0x15de   :  { %v1930_v21 = vsub.f32 %v1928_v20, %v1929_v19 }
0x15e0   :  { %v1932_v22 = vadd.f32 1e-05, %v1930_v21 }
0x15e2   :  { %2576 = vrsqrt.f32 %v1932_v22 }
0x15ef   :  { %v2577_v23 = vpop.eup %2576 }
0x15f0   :  { %v1934_v24 = vmul.f32 %v2577_v23, %v1931_v0 }
0x15f2   :  { %1940 = vperm.xlu0 %2560, %v1934_v24   ;;  %v1936_v26 = vmul.f32 %v1934_v24, %v1924_v17 }
0x15f4   :  { %v1937_v27 = vsub.f32 %v1935_v25, %v1936_v26 }
0x15f6   :  { %1946 = vperm.xlu1 %2561, %v1937_v27  }
0x166d   :  { %v1941_v28 = vpop.permute.xlu0 %1940 }
0x166e   :  { %v1943_v29 = vmul.f32 %v1941_v28, %v1918_v11 }
0x1671   :  { %v1947_v30 = vpop.permute.xlu1 %1946 }
0x1672   :  { %v1949_v31 = vadd.f32 %v1947_v30, %v1943_v29 }
0x1674   :  { %v1950_v32 = vadd.f32 %v1949_v31, %v2677_v40 }
0x1676   :  { %1951 = vst [vmem:[%s1989_s8] sm:$0xff] %v1950_v32 }

</bundles_post_ra>
